<compile_context>
chip_gen: v7x
topology: tpu7x:2x2x1
jax: 0.10.0
libtpu: 0.0.40
codegen_flags: <defaults>
</compile_context>

<pallas_src>
import functools

import jax
import jax.numpy as jnp
from jax import lax
from jax.experimental import pallas as pl
from jax.experimental.pallas import tpu as pltpu


# ---------------------------------------------------------------------------
# Fused row-tiled matmul + per-channel affine (+ optional ReLU)
#   - used for every conv layer (K = 9*Cin im2col slab) and for the hoisted
#     GRU input projection.
# ---------------------------------------------------------------------------
def _affine_kernel(x_ref, w_ref, b_ref, o_ref, *, relu):
    acc = jnp.dot(x_ref[...], w_ref[...], preferred_element_type=jnp.float32)
    acc = acc + b_ref[...]
    if relu:
        acc = jnp.maximum(acc, 0.0)
    o_ref[...] = acc.astype(o_ref.dtype)


def _affine(x, w, b, *, relu, out_dtype, block_rows=2048):
    """x: [N, K] bf16, w: [K, M] bf16, b: [1, M] f32 -> [N, M] out_dtype."""
    N, K = x.shape
    M = w.shape[1]
    if N <= block_rows:
        bn, x_p = N, x                       # single full block (no padding)
    else:
        bn = block_rows
        n_pad = pl.cdiv(N, bn) * bn          # pad rows: robust, no divisor search
        x_p = jnp.pad(x, ((0, n_pad - N), (0, 0)))
    out = pl.pallas_call(
        functools.partial(_affine_kernel, relu=relu),
        out_shape=jax.ShapeDtypeStruct((x_p.shape[0], M), out_dtype),
        grid=(x_p.shape[0] // bn,),
        in_specs=[
            pl.BlockSpec((bn, K), lambda i: (i, 0)),   # streamed row tile
            pl.BlockSpec((K, M), lambda i: (0, 0)),    # resident weights
            pl.BlockSpec((1, M), lambda i: (0, 0)),    # resident shift
        ],
        out_specs=pl.BlockSpec((bn, M), lambda i: (i, 0)),
        compiler_params=pltpu.CompilerParams(dimension_semantics=("parallel",)),
    )(x_p, w, b)
    return out[:N]


# ---------------------------------------------------------------------------
# Conv(3x3, stride 2, pad 1) + BatchNorm(eval) + ReLU
# ---------------------------------------------------------------------------
# TODO(synk): BatchNorm uses running statistics (inference mode); PyTorch
# training-mode batch statistics are not implemented.

def _im2col_stride2(x_nhwc):
    """[B, H, W, Cin] -> ([B*Hout*Wout, 9*Cin], Hout, Wout).

    Column order is (kh, kw, cin)-major/minor, matching the folded weight
    layout below.  With stride 2 the materialized slab is only ~2.25x the
    input volume (4x spatial downsample), so the kernel can run a single
    large-M, K=9*Cin MXU matmul per row tile.
    """
    B, H, W, Cin = x_nhwc.shape
    Hout, Wout = (H + 1) // 2, (W + 1) // 2
    xp = jnp.pad(x_nhwc, ((0, 0), (1, 2 * Hout - H), (1, 2 * Wout - W), (0, 0)))
    taps = []
    for kh in range(3):
        for kw in range(3):
            t = lax.slice(xp, (0, kh, kw, 0),
                          (B, kh + 2 * Hout - 1, kw + 2 * Wout - 1, Cin),
                          (1, 2, 2, 1))                 # [B, Hout, Wout, Cin]
            taps.append(t)
    cols = jnp.concatenate(taps, axis=-1)               # [B, Hout, Wout, 9*Cin]
    return cols.reshape(B * Hout * Wout, 9 * Cin), Hout, Wout


def conv_bn_relu(x_nhwc, w_oihw, b, gamma, beta, r_mean, r_var, eps=1e-5):
    """x: [B, H, W, Cin] -> [B, ceil(H/2), ceil(W/2), Cout] (bf16)."""
    B, H, W, Cin = x_nhwc.shape
    Cout = w_oihw.shape[0]

    # TODO(synk): the im2col slab lives in HBM (~2.25x input traffic); if the
    # conv stack ever becomes HBM-bound, build this K-concatenated slab in a
    # VMEM scratch from stride-2 phase planes inside the kernel instead.
    lhs, Hout, Wout = _im2col_stride2(x_nhwc.astype(jnp.bfloat16))

    # Fold conv bias + BatchNorm (running stats) into weights / per-channel shift.
    scale = gamma / jnp.sqrt(r_var + eps)                          # [Cout]
    w_mat = jnp.transpose(w_oihw, (2, 3, 1, 0)).reshape(9 * Cin, Cout)
    w_mat = (w_mat * scale[None, :]).astype(jnp.bfloat16)          # [9*Cin, Cout]
    shift = (beta + scale * (b - r_mean)).reshape(1, Cout).astype(jnp.float32)

    out = _affine(lhs, w_mat, shift, relu=True, out_dtype=jnp.bfloat16,
                  block_rows=2048)
    return out.reshape(B, Hout, Wout, Cout)


# ---------------------------------------------------------------------------
# GRU recurrence (input projection already hoisted); returns final hidden state
# ---------------------------------------------------------------------------
def _gru_kernel(gi_ref, whh_ref, bhh_ref, h_ref, *, tc, t_total):
    """One block of `tc` timesteps per grid iteration.

    gi_ref : [Tc, B, 3H] bf16  precomputed x_t @ W_ih^T + b_ih (gate order r,z,n)
    whh_ref: [H, 3H]     bf16  resident
    bhh_ref: [1, 3H]     f32   resident
    h_ref  : [B, H]      f32   output block, constant index across blocks (carry)
    """
    blk = pl.program_id(0)
    Hd = h_ref.shape[1]

    @pl.when(blk == 0)
    def _():
        h_ref[...] = jnp.zeros_like(h_ref)

    h = h_ref[...]
    whh = whh_ref[...]
    bhh = bhh_ref[...]
    for tt in range(tc):                                   # static unroll
        gi = gi_ref[tt].astype(jnp.float32)                # [B, 3H]
        gh = jnp.dot(h.astype(jnp.bfloat16), whh,
                     preferred_element_type=jnp.float32) + bhh
        r = jax.nn.sigmoid(gi[:, :Hd] + gh[:, :Hd])
        z = jax.nn.sigmoid(gi[:, Hd:2 * Hd] + gh[:, Hd:2 * Hd])
        n = jnp.tanh(gi[:, 2 * Hd:] + r * gh[:, 2 * Hd:])
        h_new = (1.0 - z) * n + z * h
        # Mask zero-padded tail timesteps (T was padded up to a multiple of Tc).
        h = jnp.where(blk * tc + tt < t_total, h_new, h)
    h_ref[...] = h


def gru_last_hidden(gi_tbh, w_hh, b_hh, *, time_block=8):
    """gi_tbh: [T, B, 3H] (already contains x @ W_ih^T + b_ih) -> [B, H] f32."""
    T, B, H3 = gi_tbh.shape
    H = H3 // 3
    tc = min(time_block, T)
    t_pad = pl.cdiv(T, tc) * tc
    gi = gi_tbh.astype(jnp.bfloat16)
    if t_pad != T:
        gi = jnp.pad(gi, ((0, t_pad - T), (0, 0), (0, 0)))

    # TODO(synk): on v7x, split the batch across the two TensorCores (the time
    # axis is serial, so a single core runs this recurrence today).
    return pl.pallas_call(
        functools.partial(_gru_kernel, tc=tc, t_total=T),
        out_shape=jax.ShapeDtypeStruct((B, H), jnp.float32),
        grid=(t_pad // tc,),
        in_specs=[
            pl.BlockSpec((tc, B, H3), lambda t: (t, 0, 0)),   # streamed gi block
            pl.BlockSpec((H, H3), lambda t: (0, 0)),          # resident W_hh^T
            pl.BlockSpec((1, H3), lambda t: (0, 0)),          # resident b_hh
        ],
        out_specs=pl.BlockSpec((B, H), lambda t: (0, 0)),     # resident carry
        compiler_params=pltpu.CompilerParams(dimension_semantics=("arbitrary",)),
    )(gi, w_hh.T.astype(jnp.bfloat16),
      b_hh.reshape(1, H3).astype(jnp.float32))


# ---------------------------------------------------------------------------
# Full ReferenceEncoder forward
# ---------------------------------------------------------------------------
def reference_encoder_forward(mels, params):
    # mels: [B, n_mel, T] -> NHWC [B, F(=mel bins), T(=frames), 1]
    x = mels[:, :, :, None]
    for layer in params["convs"]:
        x = conv_bn_relu(x, layer["w"], layer["b"], layer["gamma"],
                         layer["beta"], layer["mean"], layer["var"])

    # x: [B, F', T', C].  PyTorch: [B,C,F',T'] -> permute(0,3,1,2) -> [B,T',C*F']
    B, Fp, Tp, C = x.shape
    x = jnp.transpose(x, (0, 2, 3, 1)).reshape(B, Tp, C * Fp)
    x = jnp.transpose(x, (1, 0, 2)).reshape(Tp * B, C * Fp)   # time-major rows

    g = params["gru"]
    H3 = g["w_ih"].shape[0]
    # Hoisted input projection: one [T*B, Din] x [Din, 3H] MXU matmul, bf16 out.
    gi = _affine(x.astype(jnp.bfloat16),
                 g["w_ih"].T.astype(jnp.bfloat16),
                 g["b_ih"].reshape(1, H3).astype(jnp.float32),
                 relu=False, out_dtype=jnp.bfloat16, block_rows=512)
    gi = gi.reshape(Tp, B, H3)
    return gru_last_hidden(gi, g["w_hh"], g["b_hh"])


def init_params(key, n_mel, ref_hidden, ref_layers, embed_dim):
    params = {"convs": []}
    in_ch = 1
    for _ in range(ref_layers):
        key, k1, k2, k3, k4, k5 = jax.random.split(key, 6)
        params["convs"].append({
            "w": 0.1 * jax.random.normal(k1, (ref_hidden, in_ch, 3, 3), jnp.float32),
            "b": 0.1 * jax.random.normal(k2, (ref_hidden,), jnp.float32),
            "gamma": 1.0 + 0.1 * jax.random.normal(k3, (ref_hidden,), jnp.float32),
            "beta": 0.1 * jax.random.normal(k4, (ref_hidden,), jnp.float32),
            "mean": 0.1 * jax.random.normal(k5, (ref_hidden,), jnp.float32),
            "var": jnp.ones((ref_hidden,), jnp.float32),
        })
        in_ch = ref_hidden
    out_channels = n_mel // (2 ** ref_layers)
    din = ref_hidden * out_channels
    key, k1, k2, k3, k4 = jax.random.split(key, 5)
    params["gru"] = {
        "w_ih": 0.1 * jax.random.normal(k1, (3 * embed_dim, din), jnp.float32),
        "w_hh": 0.1 * jax.random.normal(k2, (3 * embed_dim, embed_dim), jnp.float32),
        "b_ih": 0.1 * jax.random.normal(k3, (3 * embed_dim,), jnp.float32),
        "b_hh": 0.1 * jax.random.normal(k4, (3 * embed_dim,), jnp.float32),
    }
    return params


if __name__ == "__main__":
    # Small-but-lane-aligned config: ref_hidden=embed_dim=128 keeps the channel
    # and gate dims lane-dense; n_mel=32, T=16, 3 layers keeps shapes tiny.
    B, n_mel, T = 2, 32, 16
    ref_hidden, ref_layers, embed_dim = 128, 3, 128

    key = jax.random.PRNGKey(0)
    k_mel, k_par = jax.random.split(key)
    mels = jax.random.normal(k_mel, (B, n_mel, T), jnp.float32)
    params = init_params(k_par, n_mel, ref_hidden, ref_layers, embed_dim)

    fwd = jax.jit(reference_encoder_forward)
    out = jax.block_until_ready(fwd(mels, params))
    assert out.shape == (B, embed_dim), out.shape
    print("KERNEL_OK")
</pallas_src>

<mosaic_0001>
module attributes {stable_mosaic.version = 11 : i64} {
  func.func @_affine_kernel(%arg0: i32, %arg1: memref<256x9xbf16, #tpu.memory_space<vmem>>, %arg2: memref<9x128xbf16, #tpu.memory_space<vmem>>, %arg3: memref<1x128xf32, #tpu.memory_space<vmem>>, %arg4: memref<256x128xbf16, #tpu.memory_space<vmem>>) attributes {dimension_semantics = [#tpu.dimension_semantics<parallel>], iteration_bounds = array<i64: 1>, scalar_prefetch = 0 : i64, scratch_operands = 0 : i64, tpu.core_type = #tpu.core_type<tc>, window_params = [{transform_indices = @transform_0, window_bounds = array<i64: 256, 9>}, {pipeline_mode = #tpu.pipeline_mode<synchronous>, transform_indices = @transform_1, window_bounds = array<i64: 9, 128>}, {pipeline_mode = #tpu.pipeline_mode<synchronous>, transform_indices = @transform_2, window_bounds = array<i64: 1, 128>}, {transform_indices = @transform_3, window_bounds = array<i64: 256, 128>}]} {
    %c0 = arith.constant 0 : index
    %c0_0 = arith.constant 0 : index
    %0 = vector.load %arg1[%c0, %c0_0] : memref<256x9xbf16, #tpu.memory_space<vmem>>, vector<256x9xbf16>
    %c0_1 = arith.constant 0 : index
    %c0_2 = arith.constant 0 : index
    %1 = vector.load %arg2[%c0_1, %c0_2] : memref<9x128xbf16, #tpu.memory_space<vmem>>, vector<9x128xbf16>
    %cst = arith.constant dense<0.000000e+00> : vector<256x128xf32>
    %2 = tpu.matmul %0, %1, %cst {dimension_numbers = #tpu.dot_dimension_numbers<[1], [0], [0], [1], [0, 0, 1, 1], [], []>} : vector<256x9xbf16>, vector<9x128xbf16>, vector<256x128xf32> -> vector<256x128xf32>
    %c0_3 = arith.constant 0 : index
    %c0_4 = arith.constant 0 : index
    %3 = vector.load %arg3[%c0_3, %c0_4] : memref<1x128xf32, #tpu.memory_space<vmem>>, vector<1x128xf32>
    %4 = vector.broadcast %3 : vector<1x128xf32> to vector<256x128xf32>
    %5 = arith.addf %2, %4 : vector<256x128xf32>
    %cst_5 = arith.constant 0.000000e+00 : f32
    %6 = vector.broadcast %cst_5 : f32 to vector<256x128xf32>
    %7 = arith.maximumf %5, %6 : vector<256x128xf32>
    %8 = arith.truncf %7 : vector<256x128xf32> to vector<256x128xbf16>
    %c0_6 = arith.constant 0 : index
    %c0_7 = arith.constant 0 : index
    %9 = vector.load %arg4[%c0_6, %c0_7] : memref<256x128xbf16, #tpu.memory_space<vmem>>, vector<256x128xbf16>
    tpu.vector_store %arg4[%c0_6, %c0_7], %8 {strides = array<i32>} : memref<256x128xbf16, #tpu.memory_space<vmem>>, vector<256x128xbf16>,
    return
  }
  func.func @transform_0(%arg0: i32) -> (i32, i32) {
    %c0_i32 = arith.constant 0 : i32
    %c0_i32_0 = arith.constant 0 : i32
    return %arg0, %c0_i32 : i32, i32
  }
  func.func @transform_1(%arg0: i32) -> (i32, i32) {
    %c0_i32 = arith.constant 0 : i32
    %c0_i32_0 = arith.constant 0 : i32
    %c0_i32_1 = arith.constant 0 : i32
    return %c0_i32, %c0_i32_0 : i32, i32
  }
  func.func @transform_2(%arg0: i32) -> (i32, i32) {
    %c0_i32 = arith.constant 0 : i32
    %c0_i32_0 = arith.constant 0 : i32
    %c0_i32_1 = arith.constant 0 : i32
    return %c0_i32, %c0_i32_0 : i32, i32
  }
  func.func @transform_3(%arg0: i32) -> (i32, i32) {
    %c0_i32 = arith.constant 0 : i32
    %c0_i32_0 = arith.constant 0 : i32
    return %arg0, %c0_i32 : i32, i32
  }
}

module attributes {stable_mosaic.version = 11 : i64} {
  func.func @_affine_kernel(%arg0: i32, %arg1: memref<64x1152xbf16, #tpu.memory_space<vmem>>, %arg2: memref<1152x128xbf16, #tpu.memory_space<vmem>>, %arg3: memref<1x128xf32, #tpu.memory_space<vmem>>, %arg4: memref<64x128xbf16, #tpu.memory_space<vmem>>) attributes {dimension_semantics = [#tpu.dimension_semantics<parallel>], iteration_bounds = array<i64: 1>, scalar_prefetch = 0 : i64, scratch_operands = 0 : i64, tpu.core_type = #tpu.core_type<tc>, window_params = [{transform_indices = @transform_0, window_bounds = array<i64: 64, 1152>}, {pipeline_mode = #tpu.pipeline_mode<synchronous>, transform_indices = @transform_1, window_bounds = array<i64: 1152, 128>}, {pipeline_mode = #tpu.pipeline_mode<synchronous>, transform_indices = @transform_2, window_bounds = array<i64: 1, 128>}, {transform_indices = @transform_3, window_bounds = array<i64: 64, 128>}]} {
    %c0 = arith.constant 0 : index
    %c0_0 = arith.constant 0 : index
    %0 = vector.load %arg1[%c0, %c0_0] : memref<64x1152xbf16, #tpu.memory_space<vmem>>, vector<64x1152xbf16>
    %c0_1 = arith.constant 0 : index
    %c0_2 = arith.constant 0 : index
    %1 = vector.load %arg2[%c0_1, %c0_2] : memref<1152x128xbf16, #tpu.memory_space<vmem>>, vector<1152x128xbf16>
    %cst = arith.constant dense<0.000000e+00> : vector<64x128xf32>
    %2 = tpu.matmul %0, %1, %cst {dimension_numbers = #tpu.dot_dimension_numbers<[1], [0], [0], [1], [0, 0, 1, 1], [], []>} : vector<64x1152xbf16>, vector<1152x128xbf16>, vector<64x128xf32> -> vector<64x128xf32>
    %c0_3 = arith.constant 0 : index
    %c0_4 = arith.constant 0 : index
    %3 = vector.load %arg3[%c0_3, %c0_4] : memref<1x128xf32, #tpu.memory_space<vmem>>, vector<1x128xf32>
    %4 = vector.broadcast %3 : vector<1x128xf32> to vector<64x128xf32>
    %5 = arith.addf %2, %4 : vector<64x128xf32>
    %cst_5 = arith.constant 0.000000e+00 : f32
    %6 = vector.broadcast %cst_5 : f32 to vector<64x128xf32>
    %7 = arith.maximumf %5, %6 : vector<64x128xf32>
    %8 = arith.truncf %7 : vector<64x128xf32> to vector<64x128xbf16>
    %c0_6 = arith.constant 0 : index
    %c0_7 = arith.constant 0 : index
    %9 = vector.load %arg4[%c0_6, %c0_7] : memref<64x128xbf16, #tpu.memory_space<vmem>>, vector<64x128xbf16>
    tpu.vector_store %arg4[%c0_6, %c0_7], %8 {strides = array<i32>} : memref<64x128xbf16, #tpu.memory_space<vmem>>, vector<64x128xbf16>,
    return
  }
  func.func @transform_0(%arg0: i32) -> (i32, i32) {
    %c0_i32 = arith.constant 0 : i32
    %c0_i32_0 = arith.constant 0 : i32
    return %arg0, %c0_i32 : i32, i32
  }
  func.func @transform_1(%arg0: i32) -> (i32, i32) {
    %c0_i32 = arith.constant 0 : i32
    %c0_i32_0 = arith.constant 0 : i32
    %c0_i32_1 = arith.constant 0 : i32
    return %c0_i32, %c0_i32_0 : i32, i32
  }
  func.func @transform_2(%arg0: i32) -> (i32, i32) {
    %c0_i32 = arith.constant 0 : i32
    %c0_i32_0 = arith.constant 0 : i32
    %c0_i32_1 = arith.constant 0 : i32
    return %c0_i32, %c0_i32_0 : i32, i32
  }
  func.func @transform_3(%arg0: i32) -> (i32, i32) {
    %c0_i32 = arith.constant 0 : i32
    %c0_i32_0 = arith.constant 0 : i32
    return %arg0, %c0_i32 : i32, i32
  }
}

module attributes {stable_mosaic.version = 11 : i64} {
  func.func @_affine_kernel(%arg0: i32, %arg1: memref<16x1152xbf16, #tpu.memory_space<vmem>>, %arg2: memref<1152x128xbf16, #tpu.memory_space<vmem>>, %arg3: memref<1x128xf32, #tpu.memory_space<vmem>>, %arg4: memref<16x128xbf16, #tpu.memory_space<vmem>>) attributes {dimension_semantics = [#tpu.dimension_semantics<parallel>], iteration_bounds = array<i64: 1>, scalar_prefetch = 0 : i64, scratch_operands = 0 : i64, tpu.core_type = #tpu.core_type<tc>, window_params = [{transform_indices = @transform_0, window_bounds = array<i64: 16, 1152>}, {pipeline_mode = #tpu.pipeline_mode<synchronous>, transform_indices = @transform_1, window_bounds = array<i64: 1152, 128>}, {pipeline_mode = #tpu.pipeline_mode<synchronous>, transform_indices = @transform_2, window_bounds = array<i64: 1, 128>}, {transform_indices = @transform_3, window_bounds = array<i64: 16, 128>}]} {
    %c0 = arith.constant 0 : index
    %c0_0 = arith.constant 0 : index
    %0 = vector.load %arg1[%c0, %c0_0] : memref<16x1152xbf16, #tpu.memory_space<vmem>>, vector<16x1152xbf16>
    %c0_1 = arith.constant 0 : index
    %c0_2 = arith.constant 0 : index
    %1 = vector.load %arg2[%c0_1, %c0_2] : memref<1152x128xbf16, #tpu.memory_space<vmem>>, vector<1152x128xbf16>
    %cst = arith.constant dense<0.000000e+00> : vector<16x128xf32>
    %2 = tpu.matmul %0, %1, %cst {dimension_numbers = #tpu.dot_dimension_numbers<[1], [0], [0], [1], [0, 0, 1, 1], [], []>} : vector<16x1152xbf16>, vector<1152x128xbf16>, vector<16x128xf32> -> vector<16x128xf32>
    %c0_3 = arith.constant 0 : index
    %c0_4 = arith.constant 0 : index
    %3 = vector.load %arg3[%c0_3, %c0_4] : memref<1x128xf32, #tpu.memory_space<vmem>>, vector<1x128xf32>
    %4 = vector.broadcast %3 : vector<1x128xf32> to vector<16x128xf32>
    %5 = arith.addf %2, %4 : vector<16x128xf32>
    %cst_5 = arith.constant 0.000000e+00 : f32
    %6 = vector.broadcast %cst_5 : f32 to vector<16x128xf32>
    %7 = arith.maximumf %5, %6 : vector<16x128xf32>
    %8 = arith.truncf %7 : vector<16x128xf32> to vector<16x128xbf16>
    %c0_6 = arith.constant 0 : index
    %c0_7 = arith.constant 0 : index
    %9 = vector.load %arg4[%c0_6, %c0_7] : memref<16x128xbf16, #tpu.memory_space<vmem>>, vector<16x128xbf16>
    tpu.vector_store %arg4[%c0_6, %c0_7], %8 {strides = array<i32>} : memref<16x128xbf16, #tpu.memory_space<vmem>>, vector<16x128xbf16>,
    return
  }
  func.func @transform_0(%arg0: i32) -> (i32, i32) {
    %c0_i32 = arith.constant 0 : i32
    %c0_i32_0 = arith.constant 0 : i32
    return %arg0, %c0_i32 : i32, i32
  }
  func.func @transform_1(%arg0: i32) -> (i32, i32) {
    %c0_i32 = arith.constant 0 : i32
    %c0_i32_0 = arith.constant 0 : i32
    %c0_i32_1 = arith.constant 0 : i32
    return %c0_i32, %c0_i32_0 : i32, i32
  }
  func.func @transform_2(%arg0: i32) -> (i32, i32) {
    %c0_i32 = arith.constant 0 : i32
    %c0_i32_0 = arith.constant 0 : i32
    %c0_i32_1 = arith.constant 0 : i32
    return %c0_i32, %c0_i32_0 : i32, i32
  }
  func.func @transform_3(%arg0: i32) -> (i32, i32) {
    %c0_i32 = arith.constant 0 : i32
    %c0_i32_0 = arith.constant 0 : i32
    return %arg0, %c0_i32 : i32, i32
  }
}

module attributes {stable_mosaic.version = 11 : i64} {
  func.func @_affine_kernel(%arg0: i32, %arg1: memref<4x512xbf16, #tpu.memory_space<vmem>>, %arg2: memref<512x384xbf16, #tpu.memory_space<vmem>>, %arg3: memref<1x384xf32, #tpu.memory_space<vmem>>, %arg4: memref<4x384xbf16, #tpu.memory_space<vmem>>) attributes {dimension_semantics = [#tpu.dimension_semantics<parallel>], iteration_bounds = array<i64: 1>, scalar_prefetch = 0 : i64, scratch_operands = 0 : i64, tpu.core_type = #tpu.core_type<tc>, window_params = [{transform_indices = @transform_0, window_bounds = array<i64: 4, 512>}, {pipeline_mode = #tpu.pipeline_mode<synchronous>, transform_indices = @transform_1, window_bounds = array<i64: 512, 384>}, {pipeline_mode = #tpu.pipeline_mode<synchronous>, transform_indices = @transform_2, window_bounds = array<i64: 1, 384>}, {transform_indices = @transform_3, window_bounds = array<i64: 4, 384>}]} {
    %c0 = arith.constant 0 : index
    %c0_0 = arith.constant 0 : index
    %0 = vector.load %arg1[%c0, %c0_0] : memref<4x512xbf16, #tpu.memory_space<vmem>>, vector<4x512xbf16>
    %c0_1 = arith.constant 0 : index
    %c0_2 = arith.constant 0 : index
    %1 = vector.load %arg2[%c0_1, %c0_2] : memref<512x384xbf16, #tpu.memory_space<vmem>>, vector<512x384xbf16>
    %cst = arith.constant dense<0.000000e+00> : vector<4x384xf32>
    %2 = tpu.matmul %0, %1, %cst {dimension_numbers = #tpu.dot_dimension_numbers<[1], [0], [0], [1], [0, 0, 1, 1], [], []>} : vector<4x512xbf16>, vector<512x384xbf16>, vector<4x384xf32> -> vector<4x384xf32>
    %c0_3 = arith.constant 0 : index
    %c0_4 = arith.constant 0 : index
    %3 = vector.load %arg3[%c0_3, %c0_4] : memref<1x384xf32, #tpu.memory_space<vmem>>, vector<1x384xf32>
    %4 = vector.broadcast %3 : vector<1x384xf32> to vector<4x384xf32>
    %5 = arith.addf %2, %4 : vector<4x384xf32>
    %6 = arith.truncf %5 : vector<4x384xf32> to vector<4x384xbf16>
    %c0_5 = arith.constant 0 : index
    %c0_6 = arith.constant 0 : index
    %7 = vector.load %arg4[%c0_5, %c0_6] : memref<4x384xbf16, #tpu.memory_space<vmem>>, vector<4x384xbf16>
    tpu.vector_store %arg4[%c0_5, %c0_6], %6 {strides = array<i32>} : memref<4x384xbf16, #tpu.memory_space<vmem>>, vector<4x384xbf16>,
    return
  }
  func.func @transform_0(%arg0: i32) -> (i32, i32) {
    %c0_i32 = arith.constant 0 : i32
    %c0_i32_0 = arith.constant 0 : i32
    return %arg0, %c0_i32 : i32, i32
  }
  func.func @transform_1(%arg0: i32) -> (i32, i32) {
    %c0_i32 = arith.constant 0 : i32
    %c0_i32_0 = arith.constant 0 : i32
    %c0_i32_1 = arith.constant 0 : i32
    return %c0_i32, %c0_i32_0 : i32, i32
  }
  func.func @transform_2(%arg0: i32) -> (i32, i32) {
    %c0_i32 = arith.constant 0 : i32
    %c0_i32_0 = arith.constant 0 : i32
    %c0_i32_1 = arith.constant 0 : i32
    return %c0_i32, %c0_i32_0 : i32, i32
  }
  func.func @transform_3(%arg0: i32) -> (i32, i32) {
    %c0_i32 = arith.constant 0 : i32
    %c0_i32_0 = arith.constant 0 : i32
    return %arg0, %c0_i32 : i32, i32
  }
}

module attributes {stable_mosaic.version = 11 : i64} {
  func.func @_gru_kernel(%arg0: i32, %arg1: memref<2x2x384xbf16, #tpu.memory_space<vmem>>, %arg2: memref<128x384xbf16, #tpu.memory_space<vmem>>, %arg3: memref<1x384xf32, #tpu.memory_space<vmem>>, %arg4: memref<2x128xf32, #tpu.memory_space<vmem>>) attributes {dimension_semantics = [#tpu.dimension_semantics<arbitrary>], iteration_bounds = array<i64: 1>, scalar_prefetch = 0 : i64, scratch_operands = 0 : i64, tpu.core_type = #tpu.core_type<tc>, window_params = [{transform_indices = @transform_0, window_bounds = array<i64: 2, 2, 384>}, {pipeline_mode = #tpu.pipeline_mode<synchronous>, transform_indices = @transform_1, window_bounds = array<i64: 128, 384>}, {pipeline_mode = #tpu.pipeline_mode<synchronous>, transform_indices = @transform_2, window_bounds = array<i64: 1, 384>}, {pipeline_mode = #tpu.pipeline_mode<synchronous>, transform_indices = @transform_3, window_bounds = array<i64: 2, 128>}]} {
    %c0_i32 = arith.constant 0 : i32
    %0 = arith.cmpi eq, %arg0, %c0_i32 : i32
    %1 = arith.extui %0 : i1 to i32
    %c0_i32_0 = arith.constant 0 : i32
    %2 = arith.cmpi ne, %1, %c0_i32_0 : i32
    scf.if %2 {
      %cst_24 = arith.constant 0.000000e+00 : f32
      %81 = vector.broadcast %cst_24 : f32 to vector<2x128xf32>
      %c0_25 = arith.constant 0 : index
      %c0_26 = arith.constant 0 : index
      %82 = vector.load %arg4[%c0_25, %c0_26] : memref<2x128xf32, #tpu.memory_space<vmem>>, vector<2x128xf32>
      tpu.vector_store %arg4[%c0_25, %c0_26], %81 {strides = array<i32>} : memref<2x128xf32, #tpu.memory_space<vmem>>, vector<2x128xf32>,
    } else {
    }
    %c0 = arith.constant 0 : index
    %c0_1 = arith.constant 0 : index
    %3 = vector.load %arg4[%c0, %c0_1] : memref<2x128xf32, #tpu.memory_space<vmem>>, vector<2x128xf32>
    %c0_2 = arith.constant 0 : index
    %c0_3 = arith.constant 0 : index
    %4 = vector.load %arg2[%c0_2, %c0_3] : memref<128x384xbf16, #tpu.memory_space<vmem>>, vector<128x384xbf16>
    %c0_4 = arith.constant 0 : index
    %c0_5 = arith.constant 0 : index
    %5 = vector.load %arg3[%c0_4, %c0_5] : memref<1x384xf32, #tpu.memory_space<vmem>>, vector<1x384xf32>
    %c0_6 = arith.constant 0 : index
    %c0_7 = arith.constant 0 : index
    %c0_8 = arith.constant 0 : index
    %6 = vector.load %arg1[%c0_6, %c0_7, %c0_8] : memref<2x2x384xbf16, #tpu.memory_space<vmem>>, vector<1x2x384xbf16>
    %7 = vector.shape_cast %6 : vector<1x2x384xbf16> to vector<2x384xbf16>
    %8 = arith.extf %7 : vector<2x384xbf16> to vector<2x384xf32>
    %9 = arith.truncf %3 : vector<2x128xf32> to vector<2x128xbf16>
    %cst = arith.constant dense<0.000000e+00> : vector<2x384xf32>
    %10 = tpu.matmul %9, %4, %cst {dimension_numbers = #tpu.dot_dimension_numbers<[1], [0], [0], [1], [0, 0, 1, 1], [], []>} : vector<2x128xbf16>, vector<128x384xbf16>, vector<2x384xf32> -> vector<2x384xf32>
    %11 = vector.broadcast %5 : vector<1x384xf32> to vector<2x384xf32>
    %12 = arith.addf %10, %11 : vector<2x384xf32>
    %13 = vector.extract_strided_slice %8 {offsets = [0, 0], sizes = [2, 128], strides = [1, 1]} : vector<2x384xf32> to vector<2x128xf32>
    %14 = vector.extract_strided_slice %12 {offsets = [0, 0], sizes = [2, 128], strides = [1, 1]} : vector<2x384xf32> to vector<2x128xf32>
    %15 = arith.addf %13, %14 : vector<2x128xf32>
    %16 = arith.negf %15 : vector<2x128xf32>
    %17 = math.exp %16 : vector<2x128xf32>
    %cst_9 = arith.constant 1.000000e+00 : f32
    %18 = vector.broadcast %cst_9 : f32 to vector<2x128xf32>
    %19 = arith.addf %18, %17 : vector<2x128xf32>
    %20 = arith.divf %18, %19 : vector<2x128xf32>
    %21 = vector.extract_strided_slice %8 {offsets = [0, 128], sizes = [2, 128], strides = [1, 1]} : vector<2x384xf32> to vector<2x128xf32>
    %22 = vector.extract_strided_slice %12 {offsets = [0, 128], sizes = [2, 128], strides = [1, 1]} : vector<2x384xf32> to vector<2x128xf32>
    %23 = arith.addf %21, %22 : vector<2x128xf32>
    %24 = arith.negf %23 : vector<2x128xf32>
    %25 = math.exp %24 : vector<2x128xf32>
    %cst_10 = arith.constant 1.000000e+00 : f32
    %26 = vector.broadcast %cst_10 : f32 to vector<2x128xf32>
    %27 = arith.addf %26, %25 : vector<2x128xf32>
    %28 = arith.divf %26, %27 : vector<2x128xf32>
    %29 = vector.extract_strided_slice %8 {offsets = [0, 256], sizes = [2, 128], strides = [1, 1]} : vector<2x384xf32> to vector<2x128xf32>
    %30 = vector.extract_strided_slice %12 {offsets = [0, 256], sizes = [2, 128], strides = [1, 1]} : vector<2x384xf32> to vector<2x128xf32>
    %31 = arith.mulf %20, %30 : vector<2x128xf32>
    %32 = arith.addf %29, %31 : vector<2x128xf32>
    %33 = math.tanh %32 : vector<2x128xf32>
    %cst_11 = arith.constant 1.000000e+00 : f32
    %34 = vector.broadcast %cst_11 : f32 to vector<2x128xf32>
    %35 = arith.subf %34, %28 : vector<2x128xf32>
    %36 = arith.mulf %35, %33 : vector<2x128xf32>
    %37 = arith.mulf %28, %3 : vector<2x128xf32>
    %38 = arith.addf %36, %37 : vector<2x128xf32>
    %c2_i32 = arith.constant 2 : i32
    %39 = arith.muli %arg0, %c2_i32 : i32
    %c0_i32_12 = arith.constant 0 : i32
    %40 = arith.addi %39, %c0_i32_12 : i32
    %c2_i32_13 = arith.constant 2 : i32
    %41 = arith.cmpi slt, %40, %c2_i32_13 : i32
    %42 = arith.select %41, %38, %3 : vector<2x128xf32>
    %c1 = arith.constant 1 : index
    %c0_14 = arith.constant 0 : index
    %c0_15 = arith.constant 0 : index
    %43 = vector.load %arg1[%c1, %c0_14, %c0_15] : memref<2x2x384xbf16, #tpu.memory_space<vmem>>, vector<1x2x384xbf16>
    %44 = vector.shape_cast %43 : vector<1x2x384xbf16> to vector<2x384xbf16>
    %45 = arith.extf %44 : vector<2x384xbf16> to vector<2x384xf32>
    %46 = arith.truncf %42 : vector<2x128xf32> to vector<2x128xbf16>
    %cst_16 = arith.constant dense<0.000000e+00> : vector<2x384xf32>
    %47 = tpu.matmul %46, %4, %cst_16 {dimension_numbers = #tpu.dot_dimension_numbers<[1], [0], [0], [1], [0, 0, 1, 1], [], []>} : vector<2x128xbf16>, vector<128x384xbf16>, vector<2x384xf32> -> vector<2x384xf32>
    %48 = vector.broadcast %5 : vector<1x384xf32> to vector<2x384xf32>
    %49 = arith.addf %47, %48 : vector<2x384xf32>
    %50 = vector.extract_strided_slice %45 {offsets = [0, 0], sizes = [2, 128], strides = [1, 1]} : vector<2x384xf32> to vector<2x128xf32>
    %51 = vector.extract_strided_slice %49 {offsets = [0, 0], sizes = [2, 128], strides = [1, 1]} : vector<2x384xf32> to vector<2x128xf32>
    %52 = arith.addf %50, %51 : vector<2x128xf32>
    %53 = arith.negf %52 : vector<2x128xf32>
    %54 = math.exp %53 : vector<2x128xf32>
    %cst_17 = arith.constant 1.000000e+00 : f32
    %55 = vector.broadcast %cst_17 : f32 to vector<2x128xf32>
    %56 = arith.addf %55, %54 : vector<2x128xf32>
    %57 = arith.divf %55, %56 : vector<2x128xf32>
    %58 = vector.extract_strided_slice %45 {offsets = [0, 128], sizes = [2, 128], strides = [1, 1]} : vector<2x384xf32> to vector<2x128xf32>
    %59 = vector.extract_strided_slice %49 {offsets = [0, 128], sizes = [2, 128], strides = [1, 1]} : vector<2x384xf32> to vector<2x128xf32>
    %60 = arith.addf %58, %59 : vector<2x128xf32>
    %61 = arith.negf %60 : vector<2x128xf32>
    %62 = math.exp %61 : vector<2x128xf32>
    %cst_18 = arith.constant 1.000000e+00 : f32
    %63 = vector.broadcast %cst_18 : f32 to vector<2x128xf32>
    %64 = arith.addf %63, %62 : vector<2x128xf32>
    %65 = arith.divf %63, %64 : vector<2x128xf32>
    %66 = vector.extract_strided_slice %45 {offsets = [0, 256], sizes = [2, 128], strides = [1, 1]} : vector<2x384xf32> to vector<2x128xf32>
    %67 = vector.extract_strided_slice %49 {offsets = [0, 256], sizes = [2, 128], strides = [1, 1]} : vector<2x384xf32> to vector<2x128xf32>
    %68 = arith.mulf %57, %67 : vector<2x128xf32>
    %69 = arith.addf %66, %68 : vector<2x128xf32>
    %70 = math.tanh %69 : vector<2x128xf32>
    %cst_19 = arith.constant 1.000000e+00 : f32
    %71 = vector.broadcast %cst_19 : f32 to vector<2x128xf32>
    %72 = arith.subf %71, %65 : vector<2x128xf32>
    %73 = arith.mulf %72, %70 : vector<2x128xf32>
    %74 = arith.mulf %65, %42 : vector<2x128xf32>
    %75 = arith.addf %73, %74 : vector<2x128xf32>
    %c2_i32_20 = arith.constant 2 : i32
    %76 = arith.muli %arg0, %c2_i32_20 : i32
    %c1_i32 = arith.constant 1 : i32
    %77 = arith.addi %76, %c1_i32 : i32
    %c2_i32_21 = arith.constant 2 : i32
    %78 = arith.cmpi slt, %77, %c2_i32_21 : i32
    %79 = arith.select %78, %75, %42 : vector<2x128xf32>
    %c0_22 = arith.constant 0 : index
    %c0_23 = arith.constant 0 : index
    %80 = vector.load %arg4[%c0_22, %c0_23] : memref<2x128xf32, #tpu.memory_space<vmem>>, vector<2x128xf32>
    tpu.vector_store %arg4[%c0_22, %c0_23], %79 {strides = array<i32>} : memref<2x128xf32, #tpu.memory_space<vmem>>, vector<2x128xf32>,
    return
  }
  func.func @transform_0(%arg0: i32) -> (i32, i32, i32) {
    %c0_i32 = arith.constant 0 : i32
    %c0_i32_0 = arith.constant 0 : i32
    %c0_i32_1 = arith.constant 0 : i32
    return %arg0, %c0_i32, %c0_i32_0 : i32, i32, i32
  }
  func.func @transform_1(%arg0: i32) -> (i32, i32) {
    %c0_i32 = arith.constant 0 : i32
    %c0_i32_0 = arith.constant 0 : i32
    %c0_i32_1 = arith.constant 0 : i32
    return %c0_i32, %c0_i32_0 : i32, i32
  }
  func.func @transform_2(%arg0: i32) -> (i32, i32) {
    %c0_i32 = arith.constant 0 : i32
    %c0_i32_0 = arith.constant 0 : i32
    %c0_i32_1 = arith.constant 0 : i32
    return %c0_i32, %c0_i32_0 : i32, i32
  }
  func.func @transform_3(%arg0: i32) -> (i32, i32) {
    %c0_i32 = arith.constant 0 : i32
    %c0_i32_0 = arith.constant 0 : i32
    %c0_i32_1 = arith.constant 0 : i32
    return %c0_i32, %c0_i32_0 : i32, i32
  }
}

</mosaic_0001>

<bundles_post_ra>
// kernel: reference_encoder_forward.5
= control target key start
LH: loop header
LB: loop body
LE: loop exit
PB: predicated region body
PF: predicated region fallthrough
CT: control target
= control target key end

     0   :  { %vm190_vm0 = vcmask 1043456   ;;  %vm191_vm1 = vcmask 1044480   ;;  %vm141_vm2 = vcmask 72704   ;;  %v818_v1 = vmov 65535   ;;  %s991_s1 = inlined_call_operand.vmem [shape: bf16[9,128], index: 1, kind: input, shape index: {}]   ;;  %s992_s0 = inlined_call_operand.vmem [shape: bf16[256,9], index: 0, kind: input, shape index: {}]   ;;  %s993_s2 = inlined_call_operand.vmem [shape: f32[1,128], index: 2, kind: input, shape index: {}]   ;;  %s994_s3 = inlined_call_operand.vmem [shape: bf16[256,128], index: 3, kind: output, shape index: {}]  }
   0x1   :  { %v801_v0 = vld [vmem:[%s991_s1] sm:$0x1f]   ;;  %v192_v2 = vsel %vm190_vm0, 4294967295, %v818_v1  ;;  %v804_v7 = vld [vmem:[%s992_s0 + $0x8] sm:$0xff]   ;;  %v806_v9 = vld [vmem:[%s992_s0 + $0x10] sm:$0xff]  }
   0x2   :  { %v802_v3 = vld [vmem:[%s992_s0] sm:$0xff]   ;;  %v193_v4 = vsel %vm191_vm1, %v192_v2, 0  ;;  %v805_v8 = vld [vmem:[%s992_s0 + $0x48] sm:$0xff]   ;;  %v807_v10 = vld [vmem:[%s992_s0 + $0x50] sm:$0xff]  }
   0x3   :  { %v803_v5 = vld [vmem:[%s992_s0 + $0x40] sm:$0xff]   ;;  %v195_v6 = vand.u32 %v801_v0, %v193_v4  ;;  %766 = vmatprep.mubr.msk.bf16.mxu0 %vm141_vm2, %v802_v3  ;;  %v808_v11 = vld [vmem:[%s992_s0 + $0x18] sm:$0xff]   ;;  %v812_v15 = vld [vmem:[%s992_s0 + $0x28] sm:$0xff]  }
   0x4   :  { %782 = vmatprep.mubr.msk.bf16.mxu1 %vm141_vm2, %v803_v5  ;;  %v809_v12 = vld [vmem:[%s992_s0 + $0x58] sm:$0xff]   ;;  %v810_v13 = vld [vmem:[%s992_s0 + $0x20] sm:$0xff]   ;;  %v813_v16 = vld [vmem:[%s992_s0 + $0x68] sm:$0xff]  }
   0x5   :  { %764 = vmatprep.subr.bf16.mxu0 %v195_v6  ;;  %798 = vmatprep.subr.bf16.mxu1 %v195_v6  ;;  %v811_v14 = vld [vmem:[%s992_s0 + $0x60] sm:$0xff]   ;;  %v814_v17 = vld [vmem:[%s992_s0 + $0x30] sm:$0xff]   ;;  %v816_v19 = vld [vmem:[%s992_s0 + $0x38] sm:$0xff]  }
   0x6   :  { %765 = vmatpush3.bf16.msra.mxu0 %v195_v6  ;;  %799 = vmatpush3.bf16.msra.mxu1 %v195_v6  ;;  %v815_v18 = vld [vmem:[%s992_s0 + $0x70] sm:$0xff]   ;;  %v817_v20 = vld [vmem:[%s992_s0 + $0x78] sm:$0xff]   ;;  %v909_v21 = vld [vmem:[%s993_s2] ss:$0 sm:$0xff] }
   0x9   :  { %767 = vmatmul.mubr.msk.bf16.vlgmr.msra.gmra.mrb[0].mxu0 %vm141_vm2, %v804_v7  ;;  %783 = vmatmul.mubr.msk.bf16.vlgmr.msra.gmra.mrb[0].mxu1 %vm141_vm2, %v805_v8 }
   0xa   :  { %770 = vmatprep.mubr.msk.bf16.mxu0 %vm141_vm2, %v806_v9  ;;  %786 = vmatprep.mubr.msk.bf16.mxu1 %vm141_vm2, %v807_v10 }
  0x11   :  { %771 = vmatmul.mubr.msk.bf16.gmra.mrb[4].mxu0 %vm141_vm2, %v808_v11  ;;  %787 = vmatmul.mubr.msk.bf16.gmra.mrb[4].mxu1 %vm141_vm2, %v809_v12 }
  0x12   :  { %774 = vmatprep.mubr.msk.bf16.mxu0 %vm141_vm2, %v810_v13  ;;  %790 = vmatprep.mubr.msk.bf16.mxu1 %vm141_vm2, %v811_v14 }
  0x19   :  { %775 = vmatmul.mubr.msk.bf16.gmra.mrb[8].mxu0 %vm141_vm2, %v812_v15  ;;  %791 = vmatmul.mubr.msk.bf16.gmra.mrb[8].mxu1 %vm141_vm2, %v813_v16 }
  0x1a   :  { %778 = vmatprep.mubr.msk.bf16.mxu0 %vm141_vm2, %v814_v17  ;;  %794 = vmatprep.mubr.msk.bf16.mxu1 %vm141_vm2, %v815_v18 }
  0x21   :  { %779 = vmatmul.mubr.msk.bf16.gmra.mrb[12].mxu0 %vm141_vm2, %v816_v19  ;;  %795 = vmatmul.mubr.msk.bf16.gmra.mrb[12].mxu1 %vm141_vm2, %v817_v20 }
  0xdc   :  { %v768_v22 = vpop.f32.mrb[0].mxu0  ;;  %v784_v23 = vpop.f32.mrb[0].mxu1 }
  0xdd   :  { %v240_v24 = vadd.f32 %v768_v22, %v909_v21  ;;  %v304_v25 = vadd.f32 %v784_v23, %v909_v21  ;;  %v231_v26 = vpop.f32.mrb[1].mxu0  ;;  %v295_v27 = vpop.f32.mrb[1].mxu1 }
  0xde   :  { %v232_v28 = vadd.f32 %v909_v21, %v231_v26  ;;  %v296_v29 = vadd.f32 %v909_v21, %v295_v27  ;;  %v769_v30 = vpop.f32.mrb[2].mxu0  ;;  %v785_v31 = vpop.f32.mrb[2].mxu1 }
  0xdf   :  { %v243_v32 = vadd.f32 %v769_v30, %v909_v21  ;;  %v307_v33 = vadd.f32 %v785_v31, %v909_v21  ;;  %v234_v34 = vpop.f32.mrb[3].mxu0  ;;  %v298_v35 = vpop.f32.mrb[3].mxu1  ;;  %v360_v38 = vmax.f32 %v240_v24, 0.0  ;;  %v376_v39 = vmax.f32 %v304_v25, 0.0 }
  0xe0   :  { %v235_v36 = vadd.f32 %v909_v21, %v234_v34  ;;  %v299_v37 = vadd.f32 %v909_v21, %v298_v35  ;;  %v358_v42 = vmax.f32 %v232_v28, 0.0  ;;  %v374_v43 = vmax.f32 %v296_v29, 0.0 }
  0xe1   :  { %v361_v40 = vmax.f32 %v243_v32, 0.0  ;;  %v377_v41 = vmax.f32 %v307_v33, 0.0 }
  0xe2   :  { %v359_v44 = vmax.f32 %v235_v36, 0.0  ;;  %v375_v45 = vmax.f32 %v299_v37, 0.0 }
  0xe3   :  { %v660_v46 = vpack.c.bf16 %v361_v40, %v360_v38  ;;  %v700_v47 = vpack.c.bf16 %v377_v41, %v376_v39 }
  0xe4   :  { %v655_v48 = vpack.c.bf16 %v359_v44, %v358_v42  ;;  %v695_v49 = vpack.c.bf16 %v375_v45, %v374_v43  ;;  %v772_v50 = vpop.f32.mrb[4].mxu0  ;;  %v788_v51 = vpop.f32.mrb[4].mxu1 }
  0xe5   :  { %732 = vst [vmem:[%s994_s3 + $0x8] sm:$0xff] %v660_v46   ;;  %740 = vst [vmem:[%s994_s3 + $0x48] sm:$0xff] %v700_v47   ;;  %v256_v52 = vadd.f32 %v772_v50, %v909_v21  ;;  %v320_v53 = vadd.f32 %v788_v51, %v909_v21  ;;  %v247_v54 = vpop.f32.mrb[5].mxu0  ;;  %v311_v55 = vpop.f32.mrb[5].mxu1 }
  0xe6   :  { %656 = vst [vmem:[%s994_s3] sm:$0xff] %v655_v48   ;;  %739 = vst [vmem:[%s994_s3 + $0x40] sm:$0xff] %v695_v49   ;;  %v248_v56 = vadd.f32 %v909_v21, %v247_v54  ;;  %v312_v57 = vadd.f32 %v909_v21, %v311_v55  ;;  %v773_v58 = vpop.f32.mrb[6].mxu0  ;;  %v789_v59 = vpop.f32.mrb[6].mxu1 }
  0xe7   :  { %v259_v60 = vadd.f32 %v773_v58, %v909_v21  ;;  %v323_v61 = vadd.f32 %v789_v59, %v909_v21  ;;  %v250_v62 = vpop.f32.mrb[7].mxu0  ;;  %v314_v63 = vpop.f32.mrb[7].mxu1  ;;  %v364_v2 = vmax.f32 %v256_v52, 0.0  ;;  %v380_v3 = vmax.f32 %v320_v53, 0.0 }
  0xe8   :  { %v251_v0 = vadd.f32 %v909_v21, %v250_v62  ;;  %v315_v1 = vadd.f32 %v909_v21, %v314_v63  ;;  %v362_v6 = vmax.f32 %v248_v56, 0.0  ;;  %v378_v7 = vmax.f32 %v312_v57, 0.0 }
  0xe9   :  { %v365_v4 = vmax.f32 %v259_v60, 0.0  ;;  %v381_v5 = vmax.f32 %v323_v61, 0.0 }
  0xea   :  { %v363_v8 = vmax.f32 %v251_v0, 0.0  ;;  %v379_v9 = vmax.f32 %v315_v1, 0.0 }
  0xeb   :  { %v670_v10 = vpack.c.bf16 %v365_v4, %v364_v2  ;;  %v710_v11 = vpack.c.bf16 %v381_v5, %v380_v3 }
  0xec   :  { %v665_v12 = vpack.c.bf16 %v363_v8, %v362_v6  ;;  %v705_v13 = vpack.c.bf16 %v379_v9, %v378_v7  ;;  %v776_v14 = vpop.f32.mrb[8].mxu0  ;;  %v792_v15 = vpop.f32.mrb[8].mxu1 }
  0xed   :  { %734 = vst [vmem:[%s994_s3 + $0x18] sm:$0xff] %v670_v10   ;;  %742 = vst [vmem:[%s994_s3 + $0x58] sm:$0xff] %v710_v11   ;;  %v272_v16 = vadd.f32 %v776_v14, %v909_v21  ;;  %v336_v17 = vadd.f32 %v792_v15, %v909_v21  ;;  %v263_v18 = vpop.f32.mrb[9].mxu0  ;;  %v327_v19 = vpop.f32.mrb[9].mxu1 }
  0xee   :  { %733 = vst [vmem:[%s994_s3 + $0x10] sm:$0xff] %v665_v12   ;;  %741 = vst [vmem:[%s994_s3 + $0x50] sm:$0xff] %v705_v13   ;;  %v264_v20 = vadd.f32 %v909_v21, %v263_v18  ;;  %v328_v22 = vadd.f32 %v909_v21, %v327_v19  ;;  %v777_v23 = vpop.f32.mrb[10].mxu0  ;;  %v793_v24 = vpop.f32.mrb[10].mxu1 }
  0xef   :  { %v275_v25 = vadd.f32 %v777_v23, %v909_v21  ;;  %v339_v26 = vadd.f32 %v793_v24, %v909_v21  ;;  %v266_v27 = vpop.f32.mrb[11].mxu0  ;;  %v330_v28 = vpop.f32.mrb[11].mxu1  ;;  %v368_v31 = vmax.f32 %v272_v16, 0.0  ;;  %v384_v32 = vmax.f32 %v336_v17, 0.0 }
  0xf0   :  { %v267_v29 = vadd.f32 %v909_v21, %v266_v27  ;;  %v331_v30 = vadd.f32 %v909_v21, %v330_v28  ;;  %v366_v35 = vmax.f32 %v264_v20, 0.0  ;;  %v382_v36 = vmax.f32 %v328_v22, 0.0 }
  0xf1   :  { %v369_v33 = vmax.f32 %v275_v25, 0.0  ;;  %v385_v34 = vmax.f32 %v339_v26, 0.0 }
  0xf2   :  { %v367_v37 = vmax.f32 %v267_v29, 0.0  ;;  %v383_v38 = vmax.f32 %v331_v30, 0.0 }
  0xf3   :  { %v680_v39 = vpack.c.bf16 %v369_v33, %v368_v31  ;;  %v720_v40 = vpack.c.bf16 %v385_v34, %v384_v32 }
  0xf4   :  { %v675_v41 = vpack.c.bf16 %v367_v37, %v366_v35  ;;  %v715_v42 = vpack.c.bf16 %v383_v38, %v382_v36  ;;  %v780_v43 = vpop.f32.mrb[12].mxu0  ;;  %v796_v44 = vpop.f32.mrb[12].mxu1 }
  0xf5   :  { %736 = vst [vmem:[%s994_s3 + $0x28] sm:$0xff] %v680_v39   ;;  %744 = vst [vmem:[%s994_s3 + $0x68] sm:$0xff] %v720_v40   ;;  %v288_v45 = vadd.f32 %v780_v43, %v909_v21  ;;  %v352_v46 = vadd.f32 %v796_v44, %v909_v21  ;;  %v279_v47 = vpop.f32.mrb[13].mxu0  ;;  %v343_v48 = vpop.f32.mrb[13].mxu1 }
  0xf6   :  { %735 = vst [vmem:[%s994_s3 + $0x20] sm:$0xff] %v675_v41   ;;  %743 = vst [vmem:[%s994_s3 + $0x60] sm:$0xff] %v715_v42   ;;  %v280_v49 = vadd.f32 %v909_v21, %v279_v47  ;;  %v344_v50 = vadd.f32 %v909_v21, %v343_v48  ;;  %v781_v51 = vpop.f32.mrb[14].mxu0  ;;  %v797_v52 = vpop.f32.mrb[14].mxu1 }
  0xf7   :  { %v291_v53 = vadd.f32 %v781_v51, %v909_v21  ;;  %v355_v54 = vadd.f32 %v797_v52, %v909_v21  ;;  %v282_v55 = vpop.f32.mrb[15].mxu0  ;;  %v346_v56 = vpop.f32.mrb[15].mxu1  ;;  %v372_v59 = vmax.f32 %v288_v45, 0.0  ;;  %v388_v60 = vmax.f32 %v352_v46, 0.0 }
  0xf8   :  { %v283_v57 = vadd.f32 %v909_v21, %v282_v55  ;;  %v347_v58 = vadd.f32 %v909_v21, %v346_v56  ;;  %v370_v63 = vmax.f32 %v280_v49, 0.0  ;;  %v386_v0 = vmax.f32 %v344_v50, 0.0 }
  0xf9   :  { %v373_v61 = vmax.f32 %v291_v53, 0.0  ;;  %v389_v62 = vmax.f32 %v355_v54, 0.0 }
  0xfa   :  { %v371_v1 = vmax.f32 %v283_v57, 0.0  ;;  %v387_v2 = vmax.f32 %v347_v58, 0.0 }
  0xfb   :  { %v690_v3 = vpack.c.bf16 %v373_v61, %v372_v59  ;;  %v730_v4 = vpack.c.bf16 %v389_v62, %v388_v60 }
  0xfc   :  { %v685_v5 = vpack.c.bf16 %v371_v1, %v370_v63  ;;  %v725_v6 = vpack.c.bf16 %v387_v2, %v386_v0 }
  0xfd   :  { %738 = vst [vmem:[%s994_s3 + $0x38] sm:$0xff] %v690_v3   ;;  %746 = vst [vmem:[%s994_s3 + $0x78] sm:$0xff] %v730_v4  }
  0xfe   :  { %737 = vst [vmem:[%s994_s3 + $0x30] sm:$0xff] %v685_v5   ;;  %745 = vst [vmem:[%s994_s3 + $0x70] sm:$0xff] %v725_v6  }

// kernel: reference_encoder_forward.6
= control target key start
LH: loop header
LB: loop body
LE: loop exit
PB: predicated region body
PF: predicated region fallthrough
CT: control target
= control target key end

     0   :  { %s2042_s1 = inlined_call_operand.vmem [shape: bf16[1152,128], index: 1, kind: input, shape index: {}]   ;;  %s2043_s0 = inlined_call_operand.vmem [shape: bf16[64,1152], index: 0, kind: input, shape index: {}]   ;;  %s2044_s2 = inlined_call_operand.vmem [shape: f32[1,128], index: 2, kind: input, shape index: {}]   ;;  %s2045_s3 = inlined_call_operand.vmem [shape: bf16[64,128], index: 3, kind: output, shape index: {}]  }
   0x1   :  { %v1559_v0 = vld [vmem:[%s2042_s1 + $0x40] sm:$0xff]   ;;  %v1563_v4 = vld [vmem:[%s2042_s1 + $0x48] sm:$0xff]   ;;  %v1567_v8 = vld [vmem:[%s2042_s1 + $0x50] sm:$0xff]  }
   0x2   :  { %v1560_v1 = vld [vmem:[%s2042_s1 + $0xc0] sm:$0xff]   ;;  %1347 = vmatprep.subr.bf16.mxu0 %v1559_v0  ;;  %v1564_v5 = vld [vmem:[%s2042_s1 + $0xc8] sm:$0xff]   ;;  %v1568_v9 = vld [vmem:[%s2042_s1 + $0xd0] sm:$0xff]  }
   0x3   :  { %v1561_v2 = vld [vmem:[%s2042_s1] sm:$0xff]   ;;  %1387 = vmatprep.subr.bf16.mxu1 %v1560_v1  ;;  %v1565_v6 = vld [vmem:[%s2042_s1 + $0x8] sm:$0xff]   ;;  %v1569_v10 = vld [vmem:[%s2042_s1 + $0x10] sm:$0xff]  }
   0x4   :  { %v1562_v3 = vld [vmem:[%s2042_s1 + $0x80] sm:$0xff]   ;;  %1348 = vmatpush3.bf16.msra.mxu0 %v1561_v2  ;;  %v1566_v7 = vld [vmem:[%s2042_s1 + $0x88] sm:$0xff]   ;;  %v1570_v11 = vld [vmem:[%s2042_s1 + $0x90] sm:$0xff]  }
   0x5   :  { %1388 = vmatpush3.bf16.msra.mxu1 %v1562_v3  ;;  %1349 = vmatprep.subr.bf16.mxu0 %v1563_v4  ;;  %v1571_v12 = vld [vmem:[%s2042_s1 + $0x58] sm:$0xff]   ;;  %v1575_v16 = vld [vmem:[%s2042_s1 + $0x60] sm:$0xff]   ;;  %v1579_v20 = vld [vmem:[%s2042_s1 + $0x68] sm:$0xff]  }
   0x6   :  { %1389 = vmatprep.subr.bf16.mxu1 %v1564_v5  ;;  %v1572_v13 = vld [vmem:[%s2042_s1 + $0xd8] sm:$0xff]   ;;  %v1576_v17 = vld [vmem:[%s2042_s1 + $0xe0] sm:$0xff]   ;;  %v1580_v21 = vld [vmem:[%s2042_s1 + $0xe8] sm:$0xff]  }
   0x7   :  { %v1573_v14 = vld [vmem:[%s2042_s1 + $0x18] sm:$0xff]   ;;  %v1577_v18 = vld [vmem:[%s2042_s1 + $0x20] sm:$0xff]   ;;  %v1581_v22 = vld [vmem:[%s2042_s1 + $0x28] sm:$0xff]  }
   0x8   :  { %1350 = vmatpush3.bf16.msra.mxu0 %v1565_v6  ;;  %v1574_v15 = vld [vmem:[%s2042_s1 + $0x98] sm:$0xff]   ;;  %v1578_v19 = vld [vmem:[%s2042_s1 + $0xa0] sm:$0xff]   ;;  %v1582_v23 = vld [vmem:[%s2042_s1 + $0xa8] sm:$0xff]  }
   0x9   :  { %1390 = vmatpush3.bf16.msra.mxu1 %v1566_v7  ;;  %1351 = vmatprep.subr.bf16.mxu0 %v1567_v8  ;;  %v1583_v24 = vld [vmem:[%s2042_s1 + $0x70] sm:$0xff]   ;;  %v1587_v28 = vld [vmem:[%s2042_s1 + $0x78] sm:$0xff]   ;;  %v1591_v32 = vld [vmem:[%s2043_s0] ss:$36 sps:$4 sm:$0xff]  }
   0xa   :  { %1391 = vmatprep.subr.bf16.mxu1 %v1568_v9  ;;  %v1584_v25 = vld [vmem:[%s2042_s1 + $0xf0] sm:$0xff]   ;;  %v1588_v29 = vld [vmem:[%s2042_s1 + $0xf8] sm:$0xff]   ;;  %v1593_v33 = vld [vmem:[%s2043_s0 + $0x4] ss:$36 sps:$4 sm:$0xff]  }
   0xb   :  { %v1585_v26 = vld [vmem:[%s2042_s1 + $0x30] sm:$0xff]   ;;  %v1589_v30 = vld [vmem:[%s2042_s1 + $0x38] sm:$0xff]   ;;  %v1594_v34 = vld [vmem:[%s2043_s0 + $0x8] ss:$36 sps:$4 sm:$0xff]   ;;  %854 = vmatprep.mubr.bf16.mxu0 %v1593_v33 }
   0xc   :  { %1352 = vmatpush3.bf16.msra.mxu0 %v1569_v10  ;;  %v1586_v27 = vld [vmem:[%s2042_s1 + $0xb0] sm:$0xff]   ;;  %v1590_v31 = vld [vmem:[%s2042_s1 + $0xb8] sm:$0xff]   ;;  %v1597_v36 = vld [vmem:[%s2042_s1 + $0x140] sm:$0xff]  }
   0xd   :  { %1392 = vmatpush3.bf16.msra.mxu1 %v1570_v11  ;;  %1353 = vmatprep.subr.bf16.mxu0 %v1571_v12  ;;  %v1596_v35 = vld [vmem:[%s2043_s0 + $0xc] ss:$36 sps:$4 sm:$0xff]   ;;  %v1598_v37 = vld [vmem:[%s2042_s1 + $0x1c0] sm:$0xff]   ;;  %v1607_v45 = vld [vmem:[%s2043_s0 + $0x54] ss:$36 sps:$4 sm:$0xff]  }
   0xe   :  { %1393 = vmatprep.subr.bf16.mxu1 %v1572_v13  ;;  %919 = vmatprep.mubr.bf16.mxu1 %v1596_v35  ;;  %v1599_v38 = vld [vmem:[%s2042_s1 + $0x100] sm:$0xff]   ;;  %v1601_v40 = vld [vmem:[%s2042_s1 + $0x148] sm:$0xff]   ;;  %v1610_v47 = vld [vmem:[%s2043_s0 + $0x50] ss:$36 sps:$4 sm:$0xff]  }
   0xf   :  { %v1600_v39 = vld [vmem:[%s2042_s1 + $0x180] sm:$0xff]   ;;  %v1602_v41 = vld [vmem:[%s2042_s1 + $0x1c8] sm:$0xff]   ;;  %v1611_v48 = vld [vmem:[%s2042_s1 + $0x150] sm:$0xff]  }
  0x10   :  { %1354 = vmatpush3.bf16.msra.mxu0 %v1573_v14  ;;  %v1603_v42 = vld [vmem:[%s2042_s1 + $0x108] sm:$0xff]   ;;  %v1612_v49 = vld [vmem:[%s2042_s1 + $0x1d0] sm:$0xff]   ;;  %v1615_v52 = vld [vmem:[%s2042_s1 + $0x158] sm:$0xff]  }
  0x11   :  { %1394 = vmatpush3.bf16.msra.mxu1 %v1574_v15  ;;  %1355 = vmatprep.subr.bf16.mxu0 %v1575_v16  ;;  %v1604_v43 = vld [vmem:[%s2042_s1 + $0x188] sm:$0xff]   ;;  %v1613_v50 = vld [vmem:[%s2042_s1 + $0x110] sm:$0xff]   ;;  %v1616_v53 = vld [vmem:[%s2042_s1 + $0x1d8] sm:$0xff]  }
  0x12   :  { %1395 = vmatprep.subr.bf16.mxu1 %v1576_v17  ;;  %v1605_v44 = vld [vmem:[%s2043_s0 + $0x4c] ss:$36 sps:$4 sm:$0xff]   ;;  %v1617_v54 = vld [vmem:[%s2042_s1 + $0x118] sm:$0xff]   ;;  %v1625_v60 = vld [vmem:[%s2042_s1 + $0x160] sm:$0xff]  }
  0x13   :  { %v1609_v46 = vld [vmem:[%s2043_s0 + $0x48] ss:$36 sps:$4 sm:$0xff]   ;;  %v1614_v51 = vld [vmem:[%s2042_s1 + $0x190] sm:$0xff]   ;;  %v1618_v55 = vld [vmem:[%s2042_s1 + $0x198] sm:$0xff]  }
  0x14   :  { %1356 = vmatpush3.bf16.msra.mxu0 %v1577_v18  ;;  %v1619_v56 = vld [vmem:[%s2043_s0 + $0x94] ss:$36 sps:$4 sm:$0xff]   ;;  %v1621_v57 = vld [vmem:[%s2043_s0 + $0x9c] ss:$36 sps:$4 sm:$0xff]   ;;  %v1629_v0 = vld [vmem:[%s2042_s1 + $0x168] sm:$0xff]  }
  0x15   :  { %1396 = vmatpush3.bf16.msra.mxu1 %v1578_v19  ;;  %1357 = vmatprep.subr.bf16.mxu0 %v1579_v20  ;;  %v1623_v58 = vld [vmem:[%s2043_s0 + $0x90] ss:$36 sps:$4 sm:$0xff]   ;;  %v1624_v59 = vld [vmem:[%s2043_s0 + $0x98] ss:$36 sps:$4 sm:$0xff]   ;;  %v1626_v61 = vld [vmem:[%s2042_s1 + $0x1e0] sm:$0xff]  }
  0x16   :  { %1397 = vmatprep.subr.bf16.mxu1 %v1580_v21  ;;  %v1627_v62 = vld [vmem:[%s2042_s1 + $0x120] sm:$0xff]   ;;  %v1630_v1 = vld [vmem:[%s2042_s1 + $0x1e8] sm:$0xff]   ;;  %v1637_v6 = vld [vmem:[%s2043_s0 + $0xd8] ss:$36 sps:$4 sm:$0xff]  }
  0x17   :  { %v1628_v63 = vld [vmem:[%s2042_s1 + $0x1a0] sm:$0xff]   ;;  %v1631_v2 = vld [vmem:[%s2042_s1 + $0x128] sm:$0xff]   ;;  %v1639_v8 = vld [vmem:[%s2042_s1 + $0x170] sm:$0xff]  }
  0x18   :  { %1358 = vmatpush3.bf16.msra.mxu0 %v1581_v22  ;;  %v1632_v3 = vld [vmem:[%s2042_s1 + $0x1a8] sm:$0xff]   ;;  %v1633_v4 = vld [vmem:[%s2043_s0 + $0xdc] ss:$36 sps:$4 sm:$0xff]   ;;  %v1640_v9 = vld [vmem:[%s2042_s1 + $0x1f0] sm:$0xff]  }
  0x19   :  { %1398 = vmatpush3.bf16.msra.mxu1 %v1582_v23  ;;  %1359 = vmatprep.subr.bf16.mxu0 %v1583_v24  ;;  %v1635_v5 = vld [vmem:[%s2043_s0 + $0xe4] ss:$36 sps:$4 sm:$0xff]   ;;  %v1641_v10 = vld [vmem:[%s2042_s1 + $0x130] sm:$0xff]   ;;  %v1643_v12 = vld [vmem:[%s2042_s1 + $0x178] sm:$0xff]  }
  0x1a   :  { %1399 = vmatprep.subr.bf16.mxu1 %v1584_v25  ;;  %v1638_v7 = vld [vmem:[%s2043_s0 + $0xe0] ss:$36 sps:$4 sm:$0xff]   ;;  %v1642_v11 = vld [vmem:[%s2042_s1 + $0x1b0] sm:$0xff]   ;;  %v1644_v13 = vld [vmem:[%s2042_s1 + $0x1f8] sm:$0xff]  }
  0x1b   :  { %v1645_v14 = vld [vmem:[%s2042_s1 + $0x138] sm:$0xff]   ;;  %v1647_v16 = vld [vmem:[%s2043_s0 + $0x10] ss:$36 sps:$4 sm:$0xff]   ;;  %v1653_v20 = vld [vmem:[%s2042_s1 + $0x200] sm:$0xff]  }
  0x1c   :  { %1360 = vmatpush3.bf16.msra.mxu0 %v1585_v26  ;;  %v1646_v15 = vld [vmem:[%s2042_s1 + $0x1b8] sm:$0xff]   ;;  %v1654_v21 = vld [vmem:[%s2042_s1 + $0x208] sm:$0xff]   ;;  %v1660_v25 = vld [vmem:[%s2043_s0 + $0x60] ss:$36 sps:$4 sm:$0xff]  }
  0x1d   :  { %1400 = vmatpush3.bf16.msra.mxu1 %v1586_v27  ;;  %1361 = vmatprep.subr.bf16.mxu0 %v1587_v28  ;;  %v1649_v17 = vld [vmem:[%s2043_s0 + $0x14] ss:$36 sps:$4 sm:$0xff]   ;;  %v1652_v19 = vld [vmem:[%s2043_s0 + $0x1c] ss:$36 sps:$4 sm:$0xff]   ;;  %v1657_v23 = vld [vmem:[%s2043_s0 + $0x64] ss:$36 sps:$4 sm:$0xff]  }
  0x1e   :  { %1401 = vmatprep.subr.bf16.mxu1 %v1588_v29  ;;  %v1650_v18 = vld [vmem:[%s2043_s0 + $0x18] ss:$36 sps:$4 sm:$0xff]   ;;  %v1661_v26 = vld [vmem:[%s2042_s1 + $0x210] sm:$0xff]   ;;  %v1663_v27 = vld [vmem:[%s2043_s0 + $0xa4] ss:$36 sps:$4 sm:$0xff]  }
  0x1f   :  { %v1655_v22 = vld [vmem:[%s2043_s0 + $0x5c] ss:$36 sps:$4 sm:$0xff]   ;;  %v1665_v28 = vld [vmem:[%s2043_s0 + $0xac] ss:$36 sps:$4 sm:$0xff]  }
  0x20   :  { %1362 = vmatpush3.bf16.msra.mxu0 %v1589_v30  ;;  %v1659_v24 = vld [vmem:[%s2043_s0 + $0x58] ss:$36 sps:$4 sm:$0xff]   ;;  %v1667_v30 = vld [vmem:[%s2043_s0 + $0xa0] ss:$36 sps:$4 sm:$0xff]   ;;  %v1671_v33 = vld [vmem:[%s2043_s0 + $0xec] ss:$36 sps:$4 sm:$0xff]  }
  0x21   :  { %1402 = vmatpush3.bf16.msra.mxu1 %v1590_v31  ;;  %1427 = vmatprep.subr.bf16.mxu0 %v1597_v36  ;;  %v1662_v29 = vld [vmem:[%s2042_s1 + $0x218] sm:$0xff]   ;;  %v1668_v31 = vld [vmem:[%s2043_s0 + $0xa8] ss:$36 sps:$4 sm:$0xff]  }
  0x22   :  { %1467 = vmatprep.subr.bf16.mxu1 %v1598_v37  ;;  %v1670_v35 = vld [vmem:[%s2042_s1 + $0x228] sm:$0xff]   ;;  %v1677_v37 = vld [vmem:[%s2042_s1 + $0x230] sm:$0xff]  }
  0x23   :  { %855 = vmatmul.mubr.bf16.vlgmr.msra.gmra.mrb[0].mxu0 %v1591_v32  ;;  %v1669_v32 = vld [vmem:[%s2042_s1 + $0x220] sm:$0xff]   ;;  %v1675_v36 = vld [vmem:[%s2043_s0 + $0xe8] ss:$36 sps:$4 sm:$0xff]  }
  0x24   :  { %920 = vmatmul.mubr.bf16.vlgmr.msra.gmra.mrb[0].mxu1 %v1594_v34  ;;  %1428 = vmatpush3.bf16.msra.mxu0 %v1599_v38  ;;  %v1673_v34 = vld [vmem:[%s2043_s0 + $0xf4] ss:$36 sps:$4 sm:$0xff]  }
  0x25   :  { %1468 = vmatpush3.bf16.msra.mxu1 %v1600_v39  ;;  %1429 = vmatprep.subr.bf16.mxu0 %v1601_v40  ;;  %v1676_v38 = vld [vmem:[%s2043_s0 + $0xf0] ss:$36 sps:$4 sm:$0xff]   ;;  %v1679_v39 = vld [vmem:[%s2043_s0 + $0x20] ss:$36 sps:$4 sm:$0xff]  }
  0x26   :  { %1469 = vmatprep.subr.bf16.mxu1 %v1602_v41  ;;  %862 = vmatprep.mubr.bf16.mxu0 %v1605_v44  ;;  %v1680_v40 = vld [vmem:[%s2043_s0 + $0xb0] ss:$36 sps:$4 sm:$0xff]   ;;  %v1678_v41 = vld [vmem:[%s2042_s1 + $0x238] sm:$0xff]  }
  0x27   :  { %927 = vmatprep.mubr.bf16.mxu1 %v1607_v45 }
  0x28   :  { %1430 = vmatpush3.bf16.msra.mxu0 %v1603_v42  ;;  %v1681_v42 = vld [vmem:[%s2043_s0 + $0x68] ss:$36 sps:$4 sm:$0xff]  }
  0x29   :  { %1470 = vmatpush3.bf16.msra.mxu1 %v1604_v43  ;;  %1431 = vmatprep.subr.bf16.mxu0 %v1611_v48  ;;  %v1682_v43 = vld [vmem:[%s2043_s0 + $0xf8] ss:$36 sps:$4 sm:$0xff]  }
  0x2a   :  { %1471 = vmatprep.subr.bf16.mxu1 %v1612_v49 }
  0x2b   :  { %863 = vmatmul.mubr.bf16.gmra.mrb[4].mxu0 %v1609_v46  ;;  %v1199_v46 = vld [vmem:[%s2044_s2] ss:$0 sm:$0xff] }
  0x2c   :  { %928 = vmatmul.mubr.bf16.gmra.mrb[4].mxu1 %v1610_v47  ;;  %1432 = vmatpush3.bf16.msra.mxu0 %v1613_v50 }
  0x2d   :  { %1472 = vmatpush3.bf16.msra.mxu1 %v1614_v51  ;;  %1433 = vmatprep.subr.bf16.mxu0 %v1615_v52 }
  0x2e   :  { %1473 = vmatprep.subr.bf16.mxu1 %v1616_v53  ;;  %870 = vmatprep.mubr.bf16.mxu0 %v1619_v56 }
  0x2f   :  { %935 = vmatprep.mubr.bf16.mxu1 %v1621_v57 }
  0x30   :  { %1434 = vmatpush3.bf16.msra.mxu0 %v1617_v54 }
  0x31   :  { %1474 = vmatpush3.bf16.msra.mxu1 %v1618_v55  ;;  %1435 = vmatprep.subr.bf16.mxu0 %v1625_v60 }
  0x32   :  { %1475 = vmatprep.subr.bf16.mxu1 %v1626_v61 }
  0x33   :  { %871 = vmatmul.mubr.bf16.gmra.mrb[8].mxu0 %v1623_v58 }
  0x34   :  { %936 = vmatmul.mubr.bf16.gmra.mrb[8].mxu1 %v1624_v59  ;;  %1436 = vmatpush3.bf16.msra.mxu0 %v1627_v62 }
  0x35   :  { %1476 = vmatpush3.bf16.msra.mxu1 %v1628_v63  ;;  %1437 = vmatprep.subr.bf16.mxu0 %v1629_v0 }
  0x36   :  { %1477 = vmatprep.subr.bf16.mxu1 %v1630_v1  ;;  %878 = vmatprep.mubr.bf16.mxu0 %v1633_v4 }
  0x37   :  { %943 = vmatprep.mubr.bf16.mxu1 %v1635_v5 }
  0x38   :  { %1438 = vmatpush3.bf16.msra.mxu0 %v1631_v2 }
  0x39   :  { %1478 = vmatpush3.bf16.msra.mxu1 %v1632_v3  ;;  %1439 = vmatprep.subr.bf16.mxu0 %v1639_v8 }
  0x3a   :  { %1479 = vmatprep.subr.bf16.mxu1 %v1640_v9 }
  0x3b   :  { %879 = vmatmul.mubr.bf16.gmra.mrb[12].mxu0 %v1637_v6 }
  0x3c   :  { %944 = vmatmul.mubr.bf16.gmra.mrb[12].mxu1 %v1638_v7  ;;  %1440 = vmatpush3.bf16.msra.mxu0 %v1641_v10 }
  0x3d   :  { %1480 = vmatpush3.bf16.msra.mxu1 %v1642_v11  ;;  %1441 = vmatprep.subr.bf16.mxu0 %v1643_v12 }
  0x3e   :  { %1481 = vmatprep.subr.bf16.mxu1 %v1644_v13  ;;  %984 = vmatprep.mubr.bf16.mxu0 %v1649_v17 }
  0x3f   :  { %1049 = vmatprep.mubr.bf16.mxu1 %v1652_v19 }
  0x40   :  { %1442 = vmatpush3.bf16.msra.mxu0 %v1645_v14 }
  0x41   :  { %1482 = vmatpush3.bf16.msra.mxu1 %v1646_v15  ;;  %1519 = vmatprep.subr.bf16.mxu0 %v1653_v20 }
  0x42   :  { %1543 = vmatprep.subr.bf16.mxu1 %v1653_v20 }
  0x43   :  { %985 = vmatmul.mubr.bf16.vlgmr.msra.gmra.mrb[16].mxu0 %v1647_v16 }
  0x44   :  { %1050 = vmatmul.mubr.bf16.vlgmr.msra.gmra.mrb[16].mxu1 %v1650_v18  ;;  %1520 = vmatpush3.bf16.msra.mxu0 %v1653_v20 }
  0x45   :  { %1551 = vmatpush3.bf16.msra.mxu1 %v1653_v20  ;;  %1521 = vmatprep.subr.bf16.mxu0 %v1654_v21 }
  0x46   :  { %1544 = vmatprep.subr.bf16.mxu1 %v1654_v21  ;;  %992 = vmatprep.mubr.bf16.mxu0 %v1655_v22 }
  0x47   :  { %1057 = vmatprep.mubr.bf16.mxu1 %v1657_v23 }
  0x48   :  { %1522 = vmatpush3.bf16.msra.mxu0 %v1654_v21 }
  0x49   :  { %1552 = vmatpush3.bf16.msra.mxu1 %v1654_v21  ;;  %1523 = vmatprep.subr.bf16.mxu0 %v1661_v26 }
  0x4a   :  { %1545 = vmatprep.subr.bf16.mxu1 %v1661_v26 }
  0x4b   :  { %993 = vmatmul.mubr.bf16.gmra.mrb[20].mxu0 %v1659_v24 }
  0x4c   :  { %1058 = vmatmul.mubr.bf16.gmra.mrb[20].mxu1 %v1660_v25  ;;  %1000 = vmatprep.mubr.bf16.mxu0 %v1663_v27 }
  0x4d   :  { %1524 = vmatpush3.bf16.msra.mxu0 %v1661_v26  ;;  %1065 = vmatprep.mubr.bf16.mxu1 %v1665_v28 }
  0x4e   :  { %1553 = vmatpush3.bf16.msra.mxu1 %v1661_v26  ;;  %1525 = vmatprep.subr.bf16.mxu0 %v1662_v29 }
  0x4f   :  { %1546 = vmatprep.subr.bf16.mxu1 %v1662_v29 }
  0x51   :  { %1526 = vmatpush3.bf16.msra.mxu0 %v1662_v29 }
  0x52   :  { %1554 = vmatpush3.bf16.msra.mxu1 %v1662_v29  ;;  %1527 = vmatprep.subr.bf16.mxu0 %v1669_v32 }
  0x53   :  { %1001 = vmatmul.mubr.bf16.gmra.mrb[24].mxu0 %v1667_v30  ;;  %1547 = vmatprep.subr.bf16.mxu1 %v1669_v32 }
  0x54   :  { %1066 = vmatmul.mubr.bf16.gmra.mrb[24].mxu1 %v1668_v31  ;;  %1008 = vmatprep.mubr.bf16.mxu0 %v1671_v33 }
  0x55   :  { %1528 = vmatpush3.bf16.msra.mxu0 %v1669_v32  ;;  %1073 = vmatprep.mubr.bf16.mxu1 %v1673_v34 }
  0x56   :  { %1555 = vmatpush3.bf16.msra.mxu1 %v1669_v32  ;;  %1529 = vmatprep.subr.bf16.mxu0 %v1670_v35 }
  0x57   :  { %1548 = vmatprep.subr.bf16.mxu1 %v1670_v35 }
  0x59   :  { %1530 = vmatpush3.bf16.msra.mxu0 %v1670_v35 }
  0x5a   :  { %1556 = vmatpush3.bf16.msra.mxu1 %v1670_v35  ;;  %1531 = vmatprep.subr.bf16.mxu0 %v1677_v37 }
  0x5b   :  { %1009 = vmatmul.mubr.bf16.gmra.mrb[28].mxu0 %v1675_v36  ;;  %1549 = vmatprep.subr.bf16.mxu1 %v1677_v37 }
  0x5c   :  { %1074 = vmatmul.mubr.bf16.gmra.mrb[28].mxu1 %v1676_v38  ;;  %1535 = vmatprep.mubr.bf16.mxu0 %v1679_v39 }
  0x5d   :  { %1532 = vmatpush3.bf16.msra.mxu0 %v1677_v37  ;;  %1539 = vmatprep.mubr.bf16.mxu1 %v1680_v40 }
  0x5e   :  { %1557 = vmatpush3.bf16.msra.mxu1 %v1677_v37  ;;  %1533 = vmatprep.subr.bf16.mxu0 %v1678_v41 }
  0x5f   :  { %1550 = vmatprep.subr.bf16.mxu1 %v1678_v41 }
  0x61   :  { %1534 = vmatpush3.bf16.msra.mxu0 %v1678_v41 }
  0x62   :  { %1558 = vmatpush3.bf16.msra.mxu1 %v1678_v41 }
  0x64   :  { %1536 = vmatmul.mubr.bf16.vlgmr.msra.gmra.mrb[32].mxu0 %v1681_v42 }
  0x65   :  { %1540 = vmatmul.mubr.bf16.vlgmr.msra.gmra.mrb[32].mxu1 %v1682_v43 }
  0xf6   :  { %v1363_v44 = vpop.f32.mrb[0].mxu0 }
  0xf7   :  { %v1403_v45 = vpop.f32.mrb[0].mxu1  ;;  %v1364_v47 = vpop.f32.mrb[1].mxu0 }
  0xf8   :  { %v1365_v48 = vadd.f32 %v1364_v47, %v1363_v44  ;;  %v1404_v49 = vpop.f32.mrb[1].mxu1  ;;  %v1366_v50 = vpop.f32.mrb[2].mxu0 }
  0xf9   :  { %v1405_v51 = vadd.f32 %v1404_v49, %v1403_v45  ;;  %v1406_v52 = vpop.f32.mrb[2].mxu1  ;;  %v1367_v53 = vpop.f32.mrb[3].mxu0 }
  0xfa   :  { %v857_v54 = vadd.f32 %v1365_v48, %v1199_v46  ;;  %v1368_v55 = vadd.f32 %v1367_v53, %v1366_v50  ;;  %v1407_v56 = vpop.f32.mrb[3].mxu1 }
  0xfb   :  { %v1408_v57 = vadd.f32 %v1407_v56, %v1406_v52 }
  0xfc   :  { %v922_v58 = vadd.f32 %v1405_v51, %v857_v54  ;;  %v860_v59 = vadd.f32 %v1368_v55, %v1199_v46 }
  0xfe   :  { %v925_v60 = vadd.f32 %v1408_v57, %v860_v59  ;;  %v1369_v61 = vpop.f32.mrb[4].mxu0 }
  0xff   :  { %v1409_v62 = vpop.f32.mrb[4].mxu1  ;;  %v1370_v63 = vpop.f32.mrb[5].mxu0 }
 0x100   :  { %v1371_v0 = vadd.f32 %v1370_v63, %v1369_v61  ;;  %v1410_v1 = vpop.f32.mrb[5].mxu1  ;;  %v1372_v2 = vpop.f32.mrb[6].mxu0 }
 0x101   :  { %v1411_v3 = vadd.f32 %v1410_v1, %v1409_v62  ;;  %v1412_v4 = vpop.f32.mrb[6].mxu1  ;;  %v1373_v5 = vpop.f32.mrb[7].mxu0 }
 0x102   :  { %v865_v6 = vadd.f32 %v1371_v0, %v1199_v46  ;;  %v1374_v7 = vadd.f32 %v1373_v5, %v1372_v2  ;;  %v1413_v8 = vpop.f32.mrb[7].mxu1 }
 0x103   :  { %v1414_v9 = vadd.f32 %v1413_v8, %v1412_v4 }
 0x104   :  { %v930_v10 = vadd.f32 %v1411_v3, %v865_v6  ;;  %v868_v11 = vadd.f32 %v1374_v7, %v1199_v46 }
 0x106   :  { %v933_v12 = vadd.f32 %v1414_v9, %v868_v11  ;;  %v1375_v13 = vpop.f32.mrb[8].mxu0 }
 0x107   :  { %v1415_v14 = vpop.f32.mrb[8].mxu1  ;;  %v1376_v15 = vpop.f32.mrb[9].mxu0 }
 0x108   :  { %v1377_v16 = vadd.f32 %v1376_v15, %v1375_v13  ;;  %v1416_v17 = vpop.f32.mrb[9].mxu1  ;;  %v1378_v18 = vpop.f32.mrb[10].mxu0 }
 0x109   :  { %v1417_v19 = vadd.f32 %v1416_v17, %v1415_v14  ;;  %v1418_v20 = vpop.f32.mrb[10].mxu1  ;;  %v1379_v21 = vpop.f32.mrb[11].mxu0 }
 0x10a   :  { %v873_v22 = vadd.f32 %v1377_v16, %v1199_v46  ;;  %v1380_v23 = vadd.f32 %v1379_v21, %v1378_v18  ;;  %v1419_v24 = vpop.f32.mrb[11].mxu1 }
 0x10b   :  { %v1420_v25 = vadd.f32 %v1419_v24, %v1418_v20 }
 0x10c   :  { %v938_v26 = vadd.f32 %v1417_v19, %v873_v22  ;;  %v876_v27 = vadd.f32 %v1380_v23, %v1199_v46 }
 0x10e   :  { %v941_v28 = vadd.f32 %v1420_v25, %v876_v27  ;;  %v1381_v29 = vpop.f32.mrb[12].mxu0 }
 0x10f   :  { %v1421_v30 = vpop.f32.mrb[12].mxu1  ;;  %v1382_v31 = vpop.f32.mrb[13].mxu0 }
 0x110   :  { %v1422_v32 = vpop.f32.mrb[13].mxu1  ;;  %v1383_v33 = vadd.f32 %v1382_v31, %v1381_v29  ;;  %v1384_v35 = vpop.f32.mrb[14].mxu0 }
 0x111   :  { %v1423_v34 = vadd.f32 %v1422_v32, %v1421_v30  ;;  %v1424_v36 = vpop.f32.mrb[14].mxu1  ;;  %v1385_v37 = vpop.f32.mrb[15].mxu0 }
 0x112   :  { %v1425_v38 = vpop.f32.mrb[15].mxu1  ;;  %v881_v39 = vadd.f32 %v1383_v33, %v1199_v46  ;;  %v1386_v40 = vadd.f32 %v1385_v37, %v1384_v35 }
 0x113   :  { %v1426_v41 = vadd.f32 %v1425_v38, %v1424_v36 }
 0x114   :  { %v946_v42 = vadd.f32 %v1423_v34, %v881_v39  ;;  %v884_v43 = vadd.f32 %v1386_v40, %v1199_v46 }
 0x116   :  { %v949_v44 = vadd.f32 %v1426_v41, %v884_v43  ;;  %v1443_v45 = vpop.f32.mrb[16].mxu0 }
 0x117   :  { %v1444_v47 = vpop.f32.mrb[17].mxu0  ;;  %v1483_v48 = vpop.f32.mrb[16].mxu1 }
 0x118   :  { %v1445_v49 = vadd.f32 %v1444_v47, %v1443_v45  ;;  %v1446_v50 = vpop.f32.mrb[18].mxu0  ;;  %v1484_v51 = vpop.f32.mrb[17].mxu1 }
 0x119   :  { %v1447_v52 = vpop.f32.mrb[19].mxu0  ;;  %v1485_v54 = vadd.f32 %v1484_v51, %v1483_v48  ;;  %v1486_v55 = vpop.f32.mrb[18].mxu1 }
 0x11a   :  { %v987_v53 = vadd.f32 %v1445_v49, %v922_v58  ;;  %v1448_v56 = vadd.f32 %v1447_v52, %v1446_v50  ;;  %v1487_v57 = vpop.f32.mrb[19].mxu1 }
 0x11b   :  { %v1488_v61 = vadd.f32 %v1487_v57, %v1486_v55 }
 0x11c   :  { %v990_v59 = vadd.f32 %v1448_v56, %v925_v60  ;;  %v1052_v62 = vadd.f32 %v1485_v54, %v987_v53 }
 0x11e   :  { %v1449_v63 = vpop.f32.mrb[20].mxu0  ;;  %v1055_v0 = vadd.f32 %v1488_v61, %v990_v59 }
 0x11f   :  { %v1450_v1 = vpop.f32.mrb[21].mxu0  ;;  %v1489_v46 = vpop.f32.mrb[20].mxu1 }
 0x120   :  { %v1451_v2 = vadd.f32 %v1450_v1, %v1449_v63  ;;  %v1452_v3 = vpop.f32.mrb[22].mxu0  ;;  %v1490_v4 = vpop.f32.mrb[21].mxu1 }
 0x121   :  { %v1453_v5 = vpop.f32.mrb[23].mxu0  ;;  %v1491_v7 = vadd.f32 %v1490_v4, %v1489_v46  ;;  %v1492_v8 = vpop.f32.mrb[22].mxu1 }
 0x122   :  { %v995_v6 = vadd.f32 %v1451_v2, %v930_v10  ;;  %v1454_v9 = vadd.f32 %v1453_v5, %v1452_v3  ;;  %v1493_v58 = vpop.f32.mrb[23].mxu1 }
 0x123   :  { %v1494_v13 = vadd.f32 %v1493_v58, %v1492_v8 }
 0x124   :  { %v998_v11 = vadd.f32 %v1454_v9, %v933_v12  ;;  %v1060_v14 = vadd.f32 %v1491_v7, %v995_v6 }
 0x126   :  { %v1455_v15 = vpop.f32.mrb[24].mxu0  ;;  %v1063_v60 = vadd.f32 %v1494_v13, %v998_v11 }
 0x127   :  { %v1456_v16 = vpop.f32.mrb[25].mxu0  ;;  %v1495_v17 = vpop.f32.mrb[24].mxu1 }
 0x128   :  { %v1457_v18 = vadd.f32 %v1456_v16, %v1455_v15  ;;  %v1458_v19 = vpop.f32.mrb[26].mxu0  ;;  %v1496_v20 = vpop.f32.mrb[25].mxu1 }
 0x129   :  { %v1459_v21 = vpop.f32.mrb[27].mxu0  ;;  %v1497_v23 = vadd.f32 %v1496_v20, %v1495_v17  ;;  %v1498_v24 = vpop.f32.mrb[26].mxu1 }
 0x12a   :  { %v1003_v22 = vadd.f32 %v1457_v18, %v938_v26  ;;  %v1460_v25 = vadd.f32 %v1459_v21, %v1458_v19  ;;  %v1499_v10 = vpop.f32.mrb[27].mxu1 }
 0x12b   :  { %v1500_v29 = vadd.f32 %v1499_v10, %v1498_v24 }
 0x12c   :  { %v1006_v27 = vadd.f32 %v1460_v25, %v941_v28  ;;  %v1068_v30 = vadd.f32 %v1497_v23, %v1003_v22 }
 0x12e   :  { %v1461_v31 = vpop.f32.mrb[28].mxu0  ;;  %v1071_v12 = vadd.f32 %v1500_v29, %v1006_v27 }
 0x12f   :  { %v1462_v32 = vpop.f32.mrb[29].mxu0  ;;  %v1501_v33 = vpop.f32.mrb[28].mxu1 }
 0x130   :  { %v1463_v34 = vadd.f32 %v1462_v32, %v1461_v31  ;;  %v1464_v35 = vpop.f32.mrb[30].mxu0  ;;  %v1502_v36 = vpop.f32.mrb[29].mxu1 }
 0x131   :  { %v1465_v37 = vpop.f32.mrb[31].mxu0  ;;  %v1503_v39 = vadd.f32 %v1502_v36, %v1501_v33  ;;  %v1504_v40 = vpop.f32.mrb[30].mxu1 }
 0x132   :  { %v1011_v38 = vadd.f32 %v1463_v34, %v946_v42  ;;  %v1466_v41 = vadd.f32 %v1465_v37, %v1464_v35  ;;  %v1505_v26 = vpop.f32.mrb[31].mxu1 }
 0x133   :  { %v1506_v45 = vadd.f32 %v1505_v26, %v1504_v40 }
 0x134   :  { %v1014_v43 = vadd.f32 %v1466_v41, %v949_v44  ;;  %v1076_v47 = vadd.f32 %v1503_v39, %v1011_v38 }
 0x136   :  { %v1079_v48 = vadd.f32 %v1506_v45, %v1014_v43 }
 0x137   :  { %v1537_v28 = vpop.f32.mrb[32].mxu0 }
 0x138   :  { %v1125_v49 = vadd.f32 %v1537_v28, %v1060_v14  ;;  %v1541_v50 = vpop.f32.mrb[32].mxu1  ;;  %v1116_v51 = vpop.f32.mrb[33].mxu0 }
 0x139   :  { %v1141_v52 = vadd.f32 %v1541_v50, %v1076_v47  ;;  %v1117_v53 = vadd.f32 %v1116_v51, %v1052_v62  ;;  %v1132_v54 = vpop.f32.mrb[33].mxu1  ;;  %v1538_v55 = vpop.f32.mrb[34].mxu0 }
 0x13a   :  { %v1133_v56 = vadd.f32 %v1132_v54, %v1068_v30  ;;  %v1128_v57 = vadd.f32 %v1538_v55, %v1063_v60  ;;  %v1542_v59 = vpop.f32.mrb[34].mxu1  ;;  %v1119_v42 = vpop.f32.mrb[35].mxu0  ;;  %v1149_v46 = vmax.f32 %v1125_v49, 0.0 }
 0x13b   :  { %v1144_v61 = vadd.f32 %v1542_v59, %v1079_v48  ;;  %v1120_v63 = vadd.f32 %v1119_v42, %v1055_v0  ;;  %v1135_v1 = vpop.f32.mrb[35].mxu1  ;;  %v1153_v3 = vmax.f32 %v1141_v52, 0.0  ;;  %v1147_v4 = vmax.f32 %v1117_v53, 0.0 }
 0x13c   :  { %v1150_v44 = vmax.f32 %v1128_v57, 0.0  ;;  %v1136_v2 = vadd.f32 %v1135_v1, %v1071_v12  ;;  %v1151_v7 = vmax.f32 %v1133_v56, 0.0 }
 0x13d   :  { %v1154_v5 = vmax.f32 %v1144_v61, 0.0  ;;  %v1148_v6 = vmax.f32 %v1120_v63, 0.0 }
 0x13e   :  { %v1332_v8 = vpack.c.bf16 %v1150_v44, %v1149_v46  ;;  %v1152_v9 = vmax.f32 %v1136_v2, 0.0 }
 0x13f   :  { %v1342_v62 = vpack.c.bf16 %v1154_v5, %v1153_v3  ;;  %v1327_v58 = vpack.c.bf16 %v1148_v6, %v1147_v4 }
 0x140   :  { %1344 = vst [vmem:[%s2045_s3 + $0x8] sm:$0xff] %v1332_v8   ;;  %v1337_v11 = vpack.c.bf16 %v1152_v9, %v1151_v7 }
 0x141   :  { %1346 = vst [vmem:[%s2045_s3 + $0x18] sm:$0xff] %v1342_v62   ;;  %1328 = vst [vmem:[%s2045_s3] sm:$0xff] %v1327_v58  }
 0x142   :  { %1345 = vst [vmem:[%s2045_s3 + $0x10] sm:$0xff] %v1337_v11  }

// kernel: reference_encoder_forward.7
= control target key start
LH: loop header
LB: loop body
LE: loop exit
PB: predicated region body
PF: predicated region fallthrough
CT: control target
= control target key end

     0   :  { %vm1171_vm0 = vmmov 0   ;;  %s1441_s1 = inlined_call_operand.vmem [shape: bf16[1152,128], index: 1, kind: input, shape index: {}]   ;;  %s1442_s0 = inlined_call_operand.vmem [shape: bf16[16,1152], index: 0, kind: input, shape index: {}]   ;;  %s1443_s2 = inlined_call_operand.vmem [shape: f32[1,128], index: 2, kind: input, shape index: {}]   ;;  %s1444_s3 = inlined_call_operand.vmem [shape: bf16[16,128], index: 3, kind: output, shape index: {}]  }
   0x1   :  { %v1085_v0 = vld [vmem:[%s1441_s1 + $0x40] sm:$0xff]   ;;  %v1089_v4 = vld [vmem:[%s1441_s1 + $0x48] sm:$0xff]   ;;  %v1093_v8 = vld [vmem:[%s1441_s1 + $0x50] sm:$0xff]  }
   0x2   :  { %v1086_v1 = vld [vmem:[%s1441_s1] sm:$0xff]   ;;  %966 = vmatprep.subr.bf16.mxu0 %v1085_v0  ;;  %v1090_v5 = vld [vmem:[%s1441_s1 + $0x8] sm:$0xff]   ;;  %v1094_v9 = vld [vmem:[%s1441_s1 + $0x10] sm:$0xff]  }
   0x3   :  { %v1087_v2 = vld [vmem:[%s1441_s1 + $0xc0] sm:$0xff]   ;;  %967 = vmatpush3.bf16.msra.mxu0 %v1086_v1  ;;  %v1091_v6 = vld [vmem:[%s1441_s1 + $0xc8] sm:$0xff]   ;;  %v1095_v10 = vld [vmem:[%s1441_s1 + $0xd0] sm:$0xff]  }
   0x4   :  { %v1088_v3 = vld [vmem:[%s1441_s1 + $0x80] sm:$0xff]   ;;  %988 = vmatprep.subr.bf16.mxu1 %v1087_v2  ;;  %968 = vmatprep.subr.bf16.mxu0 %v1089_v4  ;;  %v1092_v7 = vld [vmem:[%s1441_s1 + $0x88] sm:$0xff]   ;;  %v1096_v11 = vld [vmem:[%s1441_s1 + $0x90] sm:$0xff]  }
   0x5   :  { %989 = vmatpush3.bf16.msra.mxu1 %v1088_v3  ;;  %v1097_v12 = vld [vmem:[%s1441_s1 + $0x58] sm:$0xff]   ;;  %v1101_v16 = vld [vmem:[%s1441_s1 + $0x60] sm:$0xff]   ;;  %v1105_v20 = vld [vmem:[%s1441_s1 + $0x68] sm:$0xff]  }
   0x6   :  { %990 = vmatprep.subr.bf16.mxu1 %v1091_v6  ;;  %v1098_v13 = vld [vmem:[%s1441_s1 + $0x18] sm:$0xff]   ;;  %v1102_v17 = vld [vmem:[%s1441_s1 + $0x20] sm:$0xff]   ;;  %v1106_v21 = vld [vmem:[%s1441_s1 + $0x28] sm:$0xff]   ;;  %v1170_v6 = vmov 0.0  }
   0x7   :  { %969 = vmatpush3.bf16.msra.mxu0 %v1090_v5  ;;  %v1099_v14 = vld [vmem:[%s1441_s1 + $0xd8] sm:$0xff]   ;;  %v1103_v18 = vld [vmem:[%s1441_s1 + $0xe0] sm:$0xff]   ;;  %v1107_v22 = vld [vmem:[%s1441_s1 + $0xe8] sm:$0xff]  }
   0x8   :  { %970 = vmatprep.subr.bf16.mxu0 %v1093_v8  ;;  %v1100_v15 = vld [vmem:[%s1441_s1 + $0x98] sm:$0xff]   ;;  %v1104_v19 = vld [vmem:[%s1441_s1 + $0xa0] sm:$0xff]   ;;  %v1108_v23 = vld [vmem:[%s1441_s1 + $0xa8] sm:$0xff]  }
   0x9   :  { %991 = vmatpush3.bf16.msra.mxu1 %v1092_v7  ;;  %v1109_v24 = vld [vmem:[%s1441_s1 + $0x70] sm:$0xff]   ;;  %v1113_v28 = vld [vmem:[%s1441_s1 + $0x78] sm:$0xff]   ;;  %v1116_v31 = vld [vmem:[%s1442_s0] ss:$36 sps:$4 sm:$0xff]  }
   0xa   :  { %992 = vmatprep.subr.bf16.mxu1 %v1095_v10  ;;  %v1110_v25 = vld [vmem:[%s1441_s1 + $0x30] sm:$0xff]   ;;  %v1114_v29 = vld [vmem:[%s1441_s1 + $0x38] sm:$0xff]   ;;  %v1118_v32 = vld [vmem:[%s1442_s0 + $0x4] ss:$36 sps:$4 sm:$0xff]  }
   0xb   :  { %971 = vmatpush3.bf16.msra.mxu0 %v1094_v9  ;;  %v1111_v26 = vld [vmem:[%s1441_s1 + $0xf0] sm:$0xff]   ;;  %v1115_v30 = vld [vmem:[%s1441_s1 + $0xf8] sm:$0xff]   ;;  %686 = vmatprep.mubr.bf16.mxu0 %v1118_v32  ;;  %v1120_v34 = vld [vmem:[%s1441_s1 + $0x140] sm:$0xff]  }
   0xc   :  { %972 = vmatprep.subr.bf16.mxu0 %v1097_v12  ;;  %v1112_v27 = vld [vmem:[%s1441_s1 + $0xb0] sm:$0xff]   ;;  %v1119_v33 = vld [vmem:[%s1441_s1 + $0xb8] sm:$0xff]   ;;  %v1121_v35 = vld [vmem:[%s1442_s0 + $0x8] ss:$36 sps:$4 sm:$0xff]  }
   0xd   :  { %993 = vmatpush3.bf16.msra.mxu1 %v1096_v11  ;;  %v1123_v36 = vld [vmem:[%s1442_s0 + $0xc] ss:$36 sps:$4 sm:$0xff]   ;;  %v1124_v37 = vld [vmem:[%s1441_s1 + $0x100] sm:$0xff]   ;;  %v1135_v48 = vld [vmem:[%s1441_s1 + $0x158] sm:$0xff]  }
   0xe   :  { %994 = vmatprep.subr.bf16.mxu1 %v1099_v14  ;;  %727 = vmatprep.mubr.bf16.mxu1 %v1123_v36  ;;  %v1125_v38 = vld [vmem:[%s1441_s1 + $0x1c0] sm:$0xff]   ;;  %v1127_v40 = vld [vmem:[%s1441_s1 + $0x148] sm:$0xff]   ;;  %v1131_v44 = vld [vmem:[%s1441_s1 + $0x150] sm:$0xff]  }
   0xf   :  { %973 = vmatpush3.bf16.msra.mxu0 %v1098_v13  ;;  %v1126_v39 = vld [vmem:[%s1441_s1 + $0x180] sm:$0xff]   ;;  %v1128_v41 = vld [vmem:[%s1441_s1 + $0x108] sm:$0xff]   ;;  %v1132_v45 = vld [vmem:[%s1441_s1 + $0x110] sm:$0xff]  }
  0x10   :  { %974 = vmatprep.subr.bf16.mxu0 %v1101_v16  ;;  %v1129_v42 = vld [vmem:[%s1441_s1 + $0x1c8] sm:$0xff]   ;;  %v1133_v46 = vld [vmem:[%s1441_s1 + $0x1d0] sm:$0xff]   ;;  %v1136_v49 = vld [vmem:[%s1441_s1 + $0x118] sm:$0xff]  }
  0x11   :  { %995 = vmatpush3.bf16.msra.mxu1 %v1100_v15  ;;  %v1130_v43 = vld [vmem:[%s1441_s1 + $0x188] sm:$0xff]   ;;  %v1134_v47 = vld [vmem:[%s1441_s1 + $0x190] sm:$0xff]   ;;  %v1137_v50 = vld [vmem:[%s1441_s1 + $0x1d8] sm:$0xff]  }
  0x12   :  { %996 = vmatprep.subr.bf16.mxu1 %v1103_v18  ;;  %v1138_v51 = vld [vmem:[%s1441_s1 + $0x198] sm:$0xff]   ;;  %v1139_v52 = vld [vmem:[%s1441_s1 + $0x160] sm:$0xff]   ;;  %v1143_v56 = vld [vmem:[%s1441_s1 + $0x168] sm:$0xff]  }
  0x13   :  { %975 = vmatpush3.bf16.msra.mxu0 %v1102_v17  ;;  %v1140_v53 = vld [vmem:[%s1441_s1 + $0x120] sm:$0xff]   ;;  %v1144_v57 = vld [vmem:[%s1441_s1 + $0x128] sm:$0xff]   ;;  %v1147_v60 = vld [vmem:[%s1441_s1 + $0x170] sm:$0xff]  }
  0x14   :  { %976 = vmatprep.subr.bf16.mxu0 %v1105_v20  ;;  %v1141_v54 = vld [vmem:[%s1441_s1 + $0x1e0] sm:$0xff]   ;;  %v1145_v58 = vld [vmem:[%s1441_s1 + $0x1e8] sm:$0xff]   ;;  %v1148_v61 = vld [vmem:[%s1441_s1 + $0x130] sm:$0xff]  }
  0x15   :  { %997 = vmatpush3.bf16.msra.mxu1 %v1104_v19  ;;  %v1142_v55 = vld [vmem:[%s1441_s1 + $0x1a0] sm:$0xff]   ;;  %v1146_v59 = vld [vmem:[%s1441_s1 + $0x1a8] sm:$0xff]   ;;  %v1149_v62 = vld [vmem:[%s1441_s1 + $0x1f0] sm:$0xff]  }
  0x16   :  { %998 = vmatprep.subr.bf16.mxu1 %v1107_v22  ;;  %v1150_v63 = vld [vmem:[%s1441_s1 + $0x1b0] sm:$0xff]   ;;  %v1151_v0 = vld [vmem:[%s1441_s1 + $0x178] sm:$0xff]   ;;  %v1161_v9 = vld [vmem:[%s1441_s1 + $0x200] sm:$0xff]  }
  0x17   :  { %977 = vmatpush3.bf16.msra.mxu0 %v1106_v21  ;;  %v1152_v1 = vld [vmem:[%s1441_s1 + $0x138] sm:$0xff]   ;;  %v1154_v3 = vld [vmem:[%s1442_s0 + $0x10] ss:$36 sps:$4 sm:$0xff]   ;;  %v1162_v10 = vld [vmem:[%s1441_s1 + $0x208] sm:$0xff]  }
  0x18   :  { %978 = vmatprep.subr.bf16.mxu0 %v1109_v24  ;;  %v1153_v2 = vld [vmem:[%s1441_s1 + $0x1f8] sm:$0xff]   ;;  %v1163_v11 = vld [vmem:[%s1441_s1 + $0x210] sm:$0xff]   ;;  %v1165_v13 = vld [vmem:[%s1441_s1 + $0x220] sm:$0xff]  }
  0x19   :  { %999 = vmatpush3.bf16.msra.mxu1 %v1108_v23  ;;  %v1156_v4 = vld [vmem:[%s1442_s0 + $0x14] ss:$36 sps:$4 sm:$0xff]   ;;  %v1160_v8 = vld [vmem:[%s1442_s0 + $0x1c] ss:$36 sps:$4 sm:$0xff]   ;;  %v1166_v14 = vld [vmem:[%s1441_s1 + $0x228] sm:$0xff]  }
  0x1a   :  { %1000 = vmatprep.subr.bf16.mxu1 %v1111_v26  ;;  %v1157_v5 = vld [vmem:[%s1441_s1 + $0x1b8] sm:$0xff]   ;;  %v1167_v15 = vld [vmem:[%s1441_s1 + $0x230] sm:$0xff]   ;;  %v1169_v17 = vld [vmem:[%s1442_s0 + $0x20] ss:$36 sps:$4 sm:$0xff]  }
  0x1b   :  { %979 = vmatpush3.bf16.msra.mxu0 %v1110_v25  ;;  %v1158_v7 = vld [vmem:[%s1442_s0 + $0x18] ss:$36 sps:$4 sm:$0xff]   ;;  %v875_v19 = vld [vmem:[%s1443_s2] ss:$0 sm:$0xff] }
  0x1c   :  { %980 = vmatprep.subr.bf16.mxu0 %v1113_v28  ;;  %v1164_v12 = vld [vmem:[%s1441_s1 + $0x218] sm:$0xff]  }
  0x1d   :  { %1001 = vmatpush3.bf16.msra.mxu1 %v1112_v27  ;;  %v1168_v16 = vld [vmem:[%s1441_s1 + $0x238] sm:$0xff]  }
  0x1e   :  { %1002 = vmatprep.subr.bf16.mxu1 %v1115_v30 }
  0x1f   :  { %981 = vmatpush3.bf16.msra.mxu0 %v1114_v29 }
  0x20   :  { %1010 = vmatprep.subr.bf16.mxu0 %v1120_v34 }
  0x21   :  { %1003 = vmatpush3.bf16.msra.mxu1 %v1119_v33 }
  0x22   :  { %687 = vmatmul.mubr.bf16.vlgmr.msra.gmra.mrb[0].mxu0 %v1116_v31  ;;  %1032 = vmatprep.subr.bf16.mxu1 %v1125_v38 }
  0x23   :  { %1011 = vmatpush3.bf16.msra.mxu0 %v1124_v37  ;;  %768 = vmatprep.mubr.bf16.mxu0 %v1156_v4 }
  0x24   :  { %728 = vmatmul.mubr.bf16.vlgmr.msra.gmra.mrb[0].mxu1 %v1121_v35  ;;  %1012 = vmatprep.subr.bf16.mxu0 %v1127_v40 }
  0x25   :  { %1033 = vmatpush3.bf16.msra.mxu1 %v1126_v39  ;;  %809 = vmatprep.mubr.bf16.mxu1 %v1160_v8 }
  0x26   :  { %1034 = vmatprep.subr.bf16.mxu1 %v1129_v42 }
  0x27   :  { %1013 = vmatpush3.bf16.msra.mxu0 %v1128_v41 }
  0x28   :  { %1014 = vmatprep.subr.bf16.mxu0 %v1131_v44 }
  0x29   :  { %1035 = vmatpush3.bf16.msra.mxu1 %v1130_v43 }
  0x2a   :  { %1036 = vmatprep.subr.bf16.mxu1 %v1133_v46 }
  0x2b   :  { %1015 = vmatpush3.bf16.msra.mxu0 %v1132_v45 }
  0x2c   :  { %1016 = vmatprep.subr.bf16.mxu0 %v1135_v48 }
  0x2d   :  { %1037 = vmatpush3.bf16.msra.mxu1 %v1134_v47 }
  0x2e   :  { %1038 = vmatprep.subr.bf16.mxu1 %v1137_v50 }
  0x2f   :  { %1017 = vmatpush3.bf16.msra.mxu0 %v1136_v49 }
  0x30   :  { %1018 = vmatprep.subr.bf16.mxu0 %v1139_v52 }
  0x31   :  { %1039 = vmatpush3.bf16.msra.mxu1 %v1138_v51 }
  0x32   :  { %1040 = vmatprep.subr.bf16.mxu1 %v1141_v54 }
  0x33   :  { %1019 = vmatpush3.bf16.msra.mxu0 %v1140_v53 }
  0x34   :  { %1020 = vmatprep.subr.bf16.mxu0 %v1143_v56 }
  0x35   :  { %1041 = vmatpush3.bf16.msra.mxu1 %v1142_v55 }
  0x36   :  { %1042 = vmatprep.subr.bf16.mxu1 %v1145_v58 }
  0x37   :  { %1021 = vmatpush3.bf16.msra.mxu0 %v1144_v57 }
  0x38   :  { %1022 = vmatprep.subr.bf16.mxu0 %v1147_v60 }
  0x39   :  { %1043 = vmatpush3.bf16.msra.mxu1 %v1146_v59 }
  0x3a   :  { %1044 = vmatprep.subr.bf16.mxu1 %v1149_v62 }
  0x3b   :  { %1023 = vmatpush3.bf16.msra.mxu0 %v1148_v61 }
  0x3c   :  { %1024 = vmatprep.subr.bf16.mxu0 %v1151_v0 }
  0x3d   :  { %1045 = vmatpush3.bf16.msra.mxu1 %v1150_v63 }
  0x3e   :  { %1046 = vmatprep.subr.bf16.mxu1 %v1153_v2 }
  0x3f   :  { %1025 = vmatpush3.bf16.msra.mxu0 %v1152_v1 }
  0x40   :  { %1063 = vmatprep.subr.bf16.mxu0 %v1170_v6 }
  0x41   :  { %1047 = vmatpush3.bf16.msra.mxu1 %v1157_v5 }
  0x42   :  { %769 = vmatmul.mubr.bf16.vlgmr.msra.gmra.mrb[4].mxu0 %v1154_v3 }
  0x43   :  { %1079 = vmatprep.mubr.msk.bf16.mxu0 %vm1171_vm0, %v1170_v6  ;;  %1064 = vmatpush3.bf16.msra.mxu0 %v1161_v9 }
  0x44   :  { %810 = vmatmul.mubr.bf16.vlgmr.msra.gmra.mrb[4].mxu1 %v1158_v7  ;;  %1065 = vmatprep.subr.bf16.mxu0 %v1170_v6 }
  0x47   :  { %1066 = vmatpush3.bf16.msra.mxu0 %v1162_v10 }
  0x48   :  { %1067 = vmatprep.subr.bf16.mxu0 %v1170_v6 }
  0x4b   :  { %1068 = vmatpush3.bf16.msra.mxu0 %v1163_v11 }
  0x4c   :  { %1069 = vmatprep.subr.bf16.mxu0 %v1170_v6 }
  0x4f   :  { %1070 = vmatpush3.bf16.msra.mxu0 %v1164_v12 }
  0x50   :  { %1071 = vmatprep.subr.bf16.mxu0 %v1170_v6 }
  0x53   :  { %1072 = vmatpush3.bf16.msra.mxu0 %v1165_v13 }
  0x54   :  { %1073 = vmatprep.subr.bf16.mxu0 %v1170_v6 }
  0x57   :  { %1074 = vmatpush3.bf16.msra.mxu0 %v1166_v14 }
  0x58   :  { %1075 = vmatprep.subr.bf16.mxu0 %v1170_v6 }
  0x5b   :  { %1076 = vmatpush3.bf16.msra.mxu0 %v1167_v15 }
  0x5c   :  { %1077 = vmatprep.subr.bf16.mxu0 %v1170_v6 }
  0x5f   :  { %1078 = vmatpush3.bf16.msra.mxu0 %v1168_v16 }
  0x62   :  { %1080 = vmatmul.mubr.bf16.vlgmr.msra.gmra.mrb[8].mxu0 %v1169_v17 }
  0xf5   :  { %v982_v18 = vpop.f32.mrb[0].mxu0 }
  0xf6   :  { %v983_v20 = vpop.f32.mrb[1].mxu0 }
  0xf7   :  { %v984_v21 = vadd.f32 %v983_v20, %v982_v18  ;;  %v985_v22 = vpop.f32.mrb[2].mxu0  ;;  %v1004_v23 = vpop.f32.mrb[0].mxu1 }
  0xf8   :  { %v986_v24 = vpop.f32.mrb[3].mxu0  ;;  %v1005_v27 = vpop.f32.mrb[1].mxu1 }
  0xf9   :  { %v689_v25 = vadd.f32 %v984_v21, %v875_v19  ;;  %v987_v26 = vadd.f32 %v986_v24, %v985_v22  ;;  %v1006_v28 = vadd.f32 %v1005_v27, %v1004_v23  ;;  %v1007_v29 = vpop.f32.mrb[2].mxu1 }
  0xfa   :  { %v1008_v31 = vpop.f32.mrb[3].mxu1 }
  0xfb   :  { %v692_v30 = vadd.f32 %v987_v26, %v875_v19  ;;  %v730_v32 = vadd.f32 %v1006_v28, %v689_v25  ;;  %v1009_v33 = vadd.f32 %v1008_v31, %v1007_v29 }
  0xfd   :  { %v733_v34 = vadd.f32 %v1009_v33, %v692_v30 }
 0x115   :  { %v1026_v35 = vpop.f32.mrb[4].mxu0 }
 0x116   :  { %v1027_v36 = vpop.f32.mrb[5].mxu0 }
 0x117   :  { %v1028_v37 = vadd.f32 %v1027_v36, %v1026_v35  ;;  %v1029_v38 = vpop.f32.mrb[6].mxu0  ;;  %v1048_v39 = vpop.f32.mrb[4].mxu1 }
 0x118   :  { %v1030_v40 = vpop.f32.mrb[7].mxu0  ;;  %v1049_v43 = vpop.f32.mrb[5].mxu1 }
 0x119   :  { %v771_v41 = vadd.f32 %v1028_v37, %v730_v32  ;;  %v1031_v42 = vadd.f32 %v1030_v40, %v1029_v38  ;;  %v1050_v44 = vadd.f32 %v1049_v43, %v1048_v39  ;;  %v1051_v45 = vpop.f32.mrb[6].mxu1 }
 0x11a   :  { %v1052_v47 = vpop.f32.mrb[7].mxu1 }
 0x11b   :  { %v774_v46 = vadd.f32 %v1031_v42, %v733_v34  ;;  %v1053_v48 = vadd.f32 %v1052_v47, %v1051_v45  ;;  %v812_v49 = vadd.f32 %v1050_v44, %v771_v41 }
 0x11d   :  { %v815_v50 = vadd.f32 %v1053_v48, %v774_v46 }
 0x135   :  { %v852_v51 = vpop.f32.mrb[8].mxu0 }
 0x136   :  { %v853_v52 = vadd.f32 %v852_v51, %v812_v49  ;;  %v1081_v53 = vpop.f32.mrb[9].mxu0 }
 0x137   :  { %v855_v54 = vpop.f32.mrb[10].mxu0 }
 0x138   :  { %v856_v55 = vadd.f32 %v855_v54, %v815_v50  ;;  %v1082_v56 = vpop.f32.mrb[11].mxu0  ;;  %v859_v57 = vmax.f32 %v853_v52, 0.0 }
 0x13a   :  { %v860_v58 = vmax.f32 %v856_v55, 0.0 }
 0x13c   :  { %v964_v59 = vpack.c.bf16 %v860_v58, %v859_v57 }
 0x13e   :  { %965 = vst [vmem:[%s1444_s3] sm:$0xff] %v964_v59  }

// kernel: reference_encoder_forward.8
= control target key start
LH: loop header
LB: loop body
LE: loop exit
PB: predicated region body
PF: predicated region fallthrough
CT: control target
= control target key end

     0   :  { %v146_v25 = vlaneseq  ;;  %v1162_v26 = vmov 1983009808   ;;  %s1498_s1 = inlined_call_operand.vmem [shape: bf16[512,384], index: 1, kind: input, shape index: {}]   ;;  %s1499_s0 = inlined_call_operand.vmem [shape: bf16[4,512], index: 0, kind: input, shape index: {}]   ;;  %s1500_s2 = inlined_call_operand.vmem [shape: f32[1,384], index: 2, kind: input, shape index: {}]   ;;  %s1501_s3 = inlined_call_operand.vmem [shape: bf16[4,384], index: 3, kind: output, shape index: {}]  }
   0x1   :  { %v1033_v0 = vld [vmem:[%s1498_s1 + $0x4] ss:$12 sps:$4 sm:$0xff]   ;;  %v1035_v1 = vld [vmem:[%s1498_s1] ss:$12 sps:$4 sm:$0xff]   ;;  %v1036_v2 = vld [vmem:[%s1498_s1 + $0x1c] ss:$12 sps:$4 sm:$0xff]   ;;  %v164_v27 = vunpack.c.l.s4 %v1162_v26 }
   0x2   :  { %695 = vmatprep.subr.bf16.mxu0 %v1033_v0  ;;  %v1038_v3 = vld [vmem:[%s1498_s1 + $0x18] ss:$12 sps:$4 sm:$0xff]   ;;  %v1039_v4 = vld [vmem:[%s1498_s1 + $0x34] ss:$12 sps:$4 sm:$0xff]   ;;  %v1041_v5 = vld [vmem:[%s1498_s1 + $0x30] ss:$12 sps:$4 sm:$0xff]  }
   0x3   :  { %696 = vmatpush1.bf16.msra.mxu0 %v1035_v1  ;;  %v1042_v6 = vld [vmem:[%s1498_s1 + $0x4c] ss:$12 sps:$4 sm:$0xff]   ;;  %v1044_v7 = vld [vmem:[%s1498_s1 + $0x48] ss:$12 sps:$4 sm:$0xff]   ;;  %v1045_v8 = vld [vmem:[%s1498_s1 + $0x64] ss:$12 sps:$4 sm:$0xff]   ;;  %v165_v33 = vunpack.c.0.s8 %v164_v27 }
   0x4   :  { %697 = vmatprep.subr.bf16.mxu0 %v1036_v2  ;;  %v1059_v9 = vld [vmem:[%s1498_s1 + $0xc8] ss:$12 sps:$4 sm:$0xff]   ;;  %v1047_v11 = vld [vmem:[%s1498_s1 + $0x60] ss:$12 sps:$4 sm:$0xff]   ;;  %v1050_v15 = vld [vmem:[%s1498_s1 + $0x78] ss:$12 sps:$4 sm:$0xff]  }
   0x5   :  { %v1061_v10 = vld [vmem:[%s1498_s1 + $0x8] ss:$12 sps:$4 sm:$0xff]   ;;  %982 = vmatprep.subr.bf16.mxu1 %v1059_v9  ;;  %v1064_v12 = vld [vmem:[%s1498_s1 + $0xe0] ss:$12 sps:$4 sm:$0xff]   ;;  %v1069_v17 = vld [vmem:[%s1498_s1 + $0xf8] ss:$12 sps:$4 sm:$0xff]  }
   0x6   :  { %983 = vmatpush3.bf16.msra.mxu1 %v1061_v10  ;;  %v1048_v13 = vld [vmem:[%s1498_s1 + $0x7c] ss:$12 sps:$4 sm:$0xff]   ;;  %v1066_v14 = vld [vmem:[%s1498_s1 + $0x20] ss:$12 sps:$4 sm:$0xff]   ;;  %v1071_v18 = vld [vmem:[%s1498_s1 + $0x38] ss:$12 sps:$4 sm:$0xff]  }
   0x7   :  { %698 = vmatpush1.bf16.msra.mxu0 %v1038_v3  ;;  %984 = vmatprep.subr.bf16.mxu1 %v1064_v12  ;;  %v1051_v16 = vld [vmem:[%s1498_s1 + $0x94] ss:$12 sps:$4 sm:$0xff]   ;;  %v1053_v19 = vld [vmem:[%s1498_s1 + $0x90] ss:$12 sps:$4 sm:$0xff]   ;;  %v1054_v22 = vld [vmem:[%s1498_s1 + $0xac] ss:$12 sps:$4 sm:$0xff]  }
   0x8   :  { %699 = vmatprep.subr.bf16.mxu0 %v1039_v4  ;;  %v1074_v20 = vld [vmem:[%s1498_s1 + $0x110] ss:$12 sps:$4 sm:$0xff]   ;;  %v1079_v23 = vld [vmem:[%s1498_s1 + $0x128] ss:$12 sps:$4 sm:$0xff]   ;;  %v1084_v30 = vld [vmem:[%s1498_s1 + $0x140] ss:$12 sps:$4 sm:$0xff]  }
   0x9   :  { %v1076_v21 = vld [vmem:[%s1498_s1 + $0x50] ss:$12 sps:$4 sm:$0xff]   ;;  %v1056_v24 = vld [vmem:[%s1498_s1 + $0xa8] ss:$12 sps:$4 sm:$0xff]   ;;  %v1060_v31 = vld [vmem:[%s1498_s1 + $0xc0] ss:$12 sps:$4 sm:$0xff]  }
   0xa   :  { %985 = vmatpush3.bf16.msra.mxu1 %v1066_v14  ;;  %v1081_v28 = vld [vmem:[%s1498_s1 + $0x68] ss:$12 sps:$4 sm:$0xff]   ;;  %v1057_v29 = vld [vmem:[%s1498_s1 + $0xc4] ss:$12 sps:$4 sm:$0xff]   ;;  %v1270_v32 = vshrl.u32 %v146_v25, 7 }
   0xb   :  { %700 = vmatpush1.bf16.msra.mxu0 %v1041_v5  ;;  %986 = vmatprep.subr.bf16.mxu1 %v1069_v17  ;;  %v1086_v34 = vld [vmem:[%s1498_s1 + $0x80] ss:$12 sps:$4 sm:$0xff]   ;;  %v1062_v35 = vld [vmem:[%s1498_s1 + $0xdc] ss:$12 sps:$4 sm:$0xff]   ;;  %v1089_v36 = vld [vmem:[%s1498_s1 + $0x158] ss:$12 sps:$4 sm:$0xff]  }
   0xc   :  { %701 = vmatprep.subr.bf16.mxu0 %v1042_v6  ;;  %v1065_v37 = vld [vmem:[%s1498_s1 + $0xd8] ss:$12 sps:$4 sm:$0xff]   ;;  %v1067_v38 = vld [vmem:[%s1498_s1 + $0xf4] ss:$12 sps:$4 sm:$0xff]   ;;  %v1288_v39 = vsub.s32 %v165_v33, %v1270_v32  ;;  %v1094_v41 = vld [vmem:[%s1498_s1 + $0x170] ss:$12 sps:$4 sm:$0xff]  }
   0xd   :  { %v1091_v40 = vld [vmem:[%s1498_s1 + $0x98] ss:$12 sps:$4 sm:$0xff]   ;;  %v1070_v43 = vld [vmem:[%s1498_s1 + $0xf0] ss:$12 sps:$4 sm:$0xff]   ;;  %v1101_v49 = vld [vmem:[%s1498_s1 + $0x248] ss:$12 sps:$4 sm:$0xff]  }
   0xe   :  { %987 = vmatpush3.bf16.msra.mxu1 %v1071_v18  ;;  %v15_v42 = vld [vmem:[%s1499_s0] sm:$0xff]  ;;  %v1072_v44 = vld [vmem:[%s1498_s1 + $0x10c] ss:$12 sps:$4 sm:$0xff]   ;;  %v1096_v47 = vld [vmem:[%s1498_s1 + $0xb0] ss:$12 sps:$4 sm:$0xff]  }
   0xf   :  { %702 = vmatpush1.bf16.msra.mxu0 %v1044_v7  ;;  %988 = vmatprep.subr.bf16.mxu1 %v1074_v20  ;;  %v162_v45 = vcombine.high %v15_v42, %v15_v42  ;;  %v169_v46 = vrot.slane %v15_v42, %v1288_v39  ;;  %v1075_v50 = vld [vmem:[%s1498_s1 + $0x108] ss:$12 sps:$4 sm:$0xff]   ;;  %v1077_v52 = vld [vmem:[%s1498_s1 + $0x124] ss:$12 sps:$4 sm:$0xff]   ;;  %v1106_v54 = vld [vmem:[%s1498_s1 + $0x260] ss:$12 sps:$4 sm:$0xff]  }
  0x10   :  { %703 = vmatprep.subr.bf16.mxu0 %v1045_v8  ;;  %v1102_v53 = vld [vmem:[%s1498_s1 + $0x188] ss:$12 sps:$4 sm:$0xff]   ;;  %v1080_v56 = vld [vmem:[%s1498_s1 + $0x120] ss:$12 sps:$4 sm:$0xff]   ;;  %v1111_v59 = vld [vmem:[%s1498_s1 + $0x278] ss:$12 sps:$4 sm:$0xff]  }
  0x11   :  { %v177_v48 = vcombine.high %v169_v46, %v169_v46  ;;  %v1316_v51 = vrot.slane %v162_v45, %v1288_v39  ;;  %v1107_v57 = vld [vmem:[%s1498_s1 + $0x1a0] ss:$12 sps:$4 sm:$0xff]   ;;  %v1082_v58 = vld [vmem:[%s1498_s1 + $0x13c] ss:$12 sps:$4 sm:$0xff]   ;;  %v1085_v60 = vld [vmem:[%s1498_s1 + $0x138] ss:$12 sps:$4 sm:$0xff]  }
  0x12   :  { %989 = vmatpush3.bf16.msra.mxu1 %v1076_v21  ;;  %v1087_v61 = vld [vmem:[%s1498_s1 + $0x154] ss:$12 sps:$4 sm:$0xff]   ;;  %v1112_v62 = vld [vmem:[%s1498_s1 + $0x1b8] ss:$12 sps:$4 sm:$0xff]   ;;  %v1116_v63 = vld [vmem:[%s1498_s1 + $0x290] ss:$12 sps:$4 sm:$0xff]  }
  0x13   :  { %704 = vmatpush1.bf16.msra.mxu0 %v1047_v11  ;;  %990 = vmatprep.subr.bf16.mxu1 %v1079_v23  ;;  %v178_v55 = vcombine.high %v1316_v51, %v1316_v51  ;;  %v1090_v0 = vld [vmem:[%s1498_s1 + $0x150] ss:$12 sps:$4 sm:$0xff]   ;;  %v1092_v1 = vld [vmem:[%s1498_s1 + $0x16c] ss:$12 sps:$4 sm:$0xff]   ;;  %v1121_v3 = vld [vmem:[%s1498_s1 + $0x2a8] ss:$12 sps:$4 sm:$0xff]  }
  0x14   :  { %705 = vmatprep.subr.bf16.mxu0 %v1048_v13  ;;  %727 = vmatprep.mubr.bf16.mxu0 %v177_v48  ;;  %v1117_v2 = vld [vmem:[%s1498_s1 + $0x1d0] ss:$12 sps:$4 sm:$0xff]   ;;  %v1095_v4 = vld [vmem:[%s1498_s1 + $0x168] ss:$12 sps:$4 sm:$0xff]   ;;  %v1126_v7 = vld [vmem:[%s1498_s1 + $0x2c0] ss:$12 sps:$4 sm:$0xff]  }
  0x15   :  { %809 = vmatprep.mubr.bf16.mxu1 %v177_v48  ;;  %v1100_v5 = vld [vmem:[%s1498_s1 + $0x184] ss:$12 sps:$4 sm:$0xff]   ;;  %v1122_v6 = vld [vmem:[%s1498_s1 + $0x1e8] ss:$12 sps:$4 sm:$0xff]   ;;  %v1098_v8 = vld [vmem:[%s1498_s1 + $0x180] ss:$12 sps:$4 sm:$0xff]  }
  0x16   :  { %991 = vmatpush3.bf16.msra.mxu1 %v1081_v28  ;;  %v1105_v9 = vld [vmem:[%s1498_s1 + $0x19c] ss:$12 sps:$4 sm:$0xff]   ;;  %v1127_v10 = vld [vmem:[%s1498_s1 + $0x200] ss:$12 sps:$4 sm:$0xff]   ;;  %v1131_v11 = vld [vmem:[%s1498_s1 + $0x2d8] ss:$12 sps:$4 sm:$0xff]  }
  0x17   :  { %706 = vmatpush1.bf16.msra.mxu0 %v1050_v15  ;;  %992 = vmatprep.subr.bf16.mxu1 %v1084_v30  ;;  %v1103_v12 = vld [vmem:[%s1498_s1 + $0x198] ss:$12 sps:$4 sm:$0xff]   ;;  %v1110_v13 = vld [vmem:[%s1498_s1 + $0x1b4] ss:$12 sps:$4 sm:$0xff]   ;;  %v1136_v15 = vld [vmem:[%s1498_s1 + $0x2f0] ss:$12 sps:$4 sm:$0xff]  }
  0x18   :  { %707 = vmatprep.subr.bf16.mxu0 %v1051_v16  ;;  %v1132_v14 = vld [vmem:[%s1498_s1 + $0x218] ss:$12 sps:$4 sm:$0xff]   ;;  %v1108_v16 = vld [vmem:[%s1498_s1 + $0x1b0] ss:$12 sps:$4 sm:$0xff]   ;;  %v1118_v21 = vld [vmem:[%s1498_s1 + $0x1e0] ss:$12 sps:$4 sm:$0xff]  }
  0x19   :  { %v1137_v17 = vld [vmem:[%s1498_s1 + $0x230] ss:$12 sps:$4 sm:$0xff]   ;;  %v1115_v18 = vld [vmem:[%s1498_s1 + $0x1cc] ss:$12 sps:$4 sm:$0xff]   ;;  %v1133_v27 = vld [vmem:[%s1498_s1 + $0x228] ss:$12 sps:$4 sm:$0xff]  }
  0x1a   :  { %993 = vmatpush3.bf16.msra.mxu1 %v1086_v34  ;;  %v1120_v20 = vld [vmem:[%s1498_s1 + $0x1e4] ss:$12 sps:$4 sm:$0xff]   ;;  %v1135_v26 = vld [vmem:[%s1498_s1 + $0x22c] ss:$12 sps:$4 sm:$0xff]   ;;  %v1143_v30 = vld [vmem:[%s1498_s1 + $0x25c] ss:$12 sps:$4 sm:$0xff]  }
  0x1b   :  { %708 = vmatpush1.bf16.msra.mxu0 %v1053_v19  ;;  %994 = vmatprep.subr.bf16.mxu1 %v1089_v36  ;;  %v1113_v19 = vld [vmem:[%s1498_s1 + $0x1c8] ss:$12 sps:$4 sm:$0xff]   ;;  %v1123_v23 = vld [vmem:[%s1498_s1 + $0x1f8] ss:$12 sps:$4 sm:$0xff]   ;;  %v1128_v25 = vld [vmem:[%s1498_s1 + $0x210] ss:$12 sps:$4 sm:$0xff]  }
  0x1c   :  { %709 = vmatprep.subr.bf16.mxu0 %v1054_v22  ;;  %v1125_v22 = vld [vmem:[%s1498_s1 + $0x1fc] ss:$12 sps:$4 sm:$0xff]   ;;  %v1140_v28 = vld [vmem:[%s1498_s1 + $0x244] ss:$12 sps:$4 sm:$0xff]   ;;  %v1146_v33 = vld [vmem:[%s1498_s1 + $0x274] ss:$12 sps:$4 sm:$0xff]  }
  0x1d   :  { %v1144_v34 = vld [vmem:[%s1498_s1 + $0x270] ss:$12 sps:$4 sm:$0xff]   ;;  %v1147_v36 = vld [vmem:[%s1498_s1 + $0x288] ss:$12 sps:$4 sm:$0xff]  }
  0x1e   :  { %995 = vmatpush3.bf16.msra.mxu1 %v1091_v40  ;;  %v1155_v40 = vld [vmem:[%s1498_s1 + $0x2bc] ss:$12 sps:$4 sm:$0xff]   ;;  %v1158_v42 = vld [vmem:[%s1498_s1 + $0x2d4] ss:$12 sps:$4 sm:$0xff]  }
  0x1f   :  { %710 = vmatpush1.bf16.msra.mxu0 %v1056_v24  ;;  %996 = vmatprep.subr.bf16.mxu1 %v1094_v41  ;;  %v1130_v24 = vld [vmem:[%s1498_s1 + $0x214] ss:$12 sps:$4 sm:$0xff]   ;;  %v1153_v41 = vld [vmem:[%s1498_s1 + $0x2b8] ss:$12 sps:$4 sm:$0xff]  }
  0x20   :  { %711 = vmatprep.subr.bf16.mxu0 %v1057_v29  ;;  %v1138_v29 = vld [vmem:[%s1498_s1 + $0x240] ss:$12 sps:$4 sm:$0xff]   ;;  %v1159_v45 = vld [vmem:[%s1498_s1 + $0x2e8] ss:$12 sps:$4 sm:$0xff]  }
  0x22   :  { %997 = vmatpush3.bf16.msra.mxu1 %v1096_v47 }
  0x23   :  { %712 = vmatpush1.bf16.msra.mxu0 %v1060_v31  ;;  %1004 = vmatprep.subr.bf16.mxu1 %v1101_v49  ;;  %v1141_v31 = vld [vmem:[%s1498_s1 + $0x258] ss:$12 sps:$4 sm:$0xff]  }
  0x24   :  { %713 = vmatprep.subr.bf16.mxu0 %v1062_v35  ;;  %v1149_v35 = vld [vmem:[%s1498_s1 + $0x28c] ss:$12 sps:$4 sm:$0xff]  }
  0x25   :  { %810 = vmatmul.mubr.bf16.vlgmr.msra.gmra.mrb[0].mxu1 %v169_v46 }
  0x26   :  { %1005 = vmatpush3.bf16.msra.mxu1 %v1102_v53  ;;  %849 = vmatprep.mubr.bf16.mxu1 %v178_v55  ;;  %v144_v53 = vld [vmem:[%s1500_s2] sm:$0x7] }
  0x27   :  { %714 = vmatpush1.bf16.msra.mxu0 %v1065_v37  ;;  %1006 = vmatprep.subr.bf16.mxu1 %v1106_v54  ;;  %v1152_v37 = vld [vmem:[%s1498_s1 + $0x2a4] ss:$12 sps:$4 sm:$0xff]  }
  0x28   :  { %715 = vmatprep.subr.bf16.mxu0 %v1067_v38  ;;  %v1150_v38 = vld [vmem:[%s1498_s1 + $0x2a0] ss:$12 sps:$4 sm:$0xff]  }
  0x2a   :  { %1007 = vmatpush3.bf16.msra.mxu1 %v1107_v57 }
  0x2b   :  { %716 = vmatpush1.bf16.msra.mxu0 %v1070_v43  ;;  %1008 = vmatprep.subr.bf16.mxu1 %v1111_v59  ;;  %v1156_v43 = vld [vmem:[%s1498_s1 + $0x2d0] ss:$12 sps:$4 sm:$0xff]  }
  0x2c   :  { %717 = vmatprep.subr.bf16.mxu0 %v1072_v44  ;;  %v1161_v44 = vld [vmem:[%s1498_s1 + $0x2ec] ss:$12 sps:$4 sm:$0xff]  }
  0x2e   :  { %1009 = vmatpush3.bf16.msra.mxu1 %v1112_v62  ;;  %v152_v62 = vsub.s32 1, %v1270_v32 }
  0x2f   :  { %718 = vmatpush1.bf16.msra.mxu0 %v1075_v50  ;;  %1010 = vmatprep.subr.bf16.mxu1 %v1116_v63 }
  0x30   :  { %719 = vmatprep.subr.bf16.mxu0 %v1077_v52  ;;  %v156_v52 = vsub.s32 2, %v1270_v32 }
  0x32   :  { %1011 = vmatpush3.bf16.msra.mxu1 %v1117_v2  ;;  %v157_v54 = vrot.slane %v144_v53, %v156_v52 }
  0x33   :  { %720 = vmatpush1.bf16.msra.mxu0 %v1080_v56  ;;  %1012 = vmatprep.subr.bf16.mxu1 %v1121_v3 }
  0x34   :  { %721 = vmatprep.subr.bf16.mxu0 %v1082_v58 }
  0x36   :  { %1013 = vmatpush3.bf16.msra.mxu1 %v1122_v6 }
  0x37   :  { %722 = vmatpush1.bf16.msra.mxu0 %v1085_v60  ;;  %1014 = vmatprep.subr.bf16.mxu1 %v1126_v7 }
  0x38   :  { %723 = vmatprep.subr.bf16.mxu0 %v1087_v61 }
  0x3a   :  { %1015 = vmatpush3.bf16.msra.mxu1 %v1127_v10 }
  0x3b   :  { %724 = vmatpush1.bf16.msra.mxu0 %v1090_v0  ;;  %1016 = vmatprep.subr.bf16.mxu1 %v1131_v11  ;;  %v153_v0 = vrot.slane %v144_v53, %v152_v62 }
  0x3c   :  { %725 = vmatprep.subr.bf16.mxu0 %v1092_v1 }
  0x3e   :  { %1017 = vmatpush3.bf16.msra.mxu1 %v1132_v14 }
  0x3f   :  { %726 = vmatpush1.bf16.msra.mxu0 %v1095_v4  ;;  %1018 = vmatprep.subr.bf16.mxu1 %v1136_v15 }
  0x40   :  { %736 = vmatprep.subr.bf16.mxu0 %v1100_v5 }
  0x42   :  { %728 = vmatmul.mubr.bf16.vlgmr.msra.gmra.mrb[0].mxu0 %v169_v46  ;;  %1019 = vmatpush3.bf16.msra.mxu1 %v1137_v17 }
  0x43   :  { %737 = vmatpush1.bf16.msra.mxu0 %v1098_v8  ;;  %768 = vmatprep.mubr.bf16.mxu0 %v178_v55 }
  0x44   :  { %738 = vmatprep.subr.bf16.mxu0 %v1105_v9 }
  0x45   :  { %850 = vmatmul.mubr.bf16.vlgmr.msra.gmra.mrb[4].mxu1 %v1316_v51 }
  0x47   :  { %739 = vmatpush1.bf16.msra.mxu0 %v1103_v12 }
  0x48   :  { %740 = vmatprep.subr.bf16.mxu0 %v1110_v13 }
  0x4b   :  { %741 = vmatpush1.bf16.msra.mxu0 %v1108_v16 }
  0x4c   :  { %742 = vmatprep.subr.bf16.mxu0 %v1115_v18 }
  0x4f   :  { %743 = vmatpush1.bf16.msra.mxu0 %v1113_v19 }
  0x50   :  { %744 = vmatprep.subr.bf16.mxu0 %v1120_v20 }
  0x53   :  { %745 = vmatpush1.bf16.msra.mxu0 %v1118_v21 }
  0x54   :  { %746 = vmatprep.subr.bf16.mxu0 %v1125_v22 }
  0x57   :  { %747 = vmatpush1.bf16.msra.mxu0 %v1123_v23 }
  0x58   :  { %748 = vmatprep.subr.bf16.mxu0 %v1130_v24 }
  0x5b   :  { %749 = vmatpush1.bf16.msra.mxu0 %v1128_v25 }
  0x5c   :  { %750 = vmatprep.subr.bf16.mxu0 %v1135_v26 }
  0x5f   :  { %751 = vmatpush1.bf16.msra.mxu0 %v1133_v27 }
  0x60   :  { %752 = vmatprep.subr.bf16.mxu0 %v1140_v28 }
  0x63   :  { %753 = vmatpush1.bf16.msra.mxu0 %v1138_v29 }
  0x64   :  { %754 = vmatprep.subr.bf16.mxu0 %v1143_v30 }
  0x67   :  { %755 = vmatpush1.bf16.msra.mxu0 %v1141_v31 }
  0x68   :  { %756 = vmatprep.subr.bf16.mxu0 %v1146_v33 }
  0x6b   :  { %757 = vmatpush1.bf16.msra.mxu0 %v1144_v34 }
  0x6c   :  { %758 = vmatprep.subr.bf16.mxu0 %v1149_v35 }
  0x6f   :  { %759 = vmatpush1.bf16.msra.mxu0 %v1147_v36 }
  0x70   :  { %760 = vmatprep.subr.bf16.mxu0 %v1152_v37 }
  0x73   :  { %761 = vmatpush1.bf16.msra.mxu0 %v1150_v38 }
  0x74   :  { %762 = vmatprep.subr.bf16.mxu0 %v1155_v40 }
  0x77   :  { %763 = vmatpush1.bf16.msra.mxu0 %v1153_v41 }
  0x78   :  { %764 = vmatprep.subr.bf16.mxu0 %v1158_v42 }
  0x7b   :  { %765 = vmatpush1.bf16.msra.mxu0 %v1156_v43 }
  0x7c   :  { %766 = vmatprep.subr.bf16.mxu0 %v1161_v44 }
  0x7f   :  { %767 = vmatpush1.bf16.msra.mxu0 %v1159_v45 }
  0x82   :  { %769 = vmatmul.mubr.bf16.vlgmr.msra.gmra.mrb[0].mxu0 %v1316_v51  ;;  %v148_v51 = vsub.s32 0, %v1270_v32 }
  0x84   :  { %v149_v63 = vrot.slane %v144_v53, %v148_v51 }
  0xf8   :  { %v998_v46 = vpop.f32.mrb[0].mxu1 }
  0xf9   :  { %v999_v47 = vpop.f32.mrb[1].mxu1 }
  0xfa   :  { %v1000_v48 = vadd.f32 %v999_v47, %v998_v46  ;;  %v1001_v49 = vpop.f32.mrb[2].mxu1 }
  0xfb   :  { %v1002_v50 = vpop.f32.mrb[3].mxu1 }
  0xfc   :  { %v812_v55 = vadd.f32 %v1000_v48, %v157_v54 }
 0x118   :  { %v1020_v56 = vpop.f32.mrb[4].mxu1 }
 0x119   :  { %v1021_v57 = vpop.f32.mrb[5].mxu1 }
 0x11a   :  { %v1022_v58 = vadd.f32 %v1021_v57, %v1020_v56  ;;  %v1023_v59 = vpop.f32.mrb[6].mxu1 }
 0x11b   :  { %v1024_v60 = vpop.f32.mrb[7].mxu1 }
 0x11c   :  { %v852_v61 = vadd.f32 %v1022_v58, %v812_v55 }
 0x11e   :  { %v859_v4 = vpack.c.bf16 %v852_v61, %v852_v61 }
 0x120   :  { %v877_v9 = vrot.slane %v859_v4, %v1288_v39 }
 0x155   :  { %v770_v1 = vpop.f32.mrb[0].mxu0 }
 0x156   :  { %v1026_v2 = vadd.f32 %v770_v1, %v149_v63  ;;  %v772_v3 = vpop.f32.mrb[1].mxu0 }
 0x157   :  { %v1027_v5 = vadd.f32 %v772_v3, %v153_v0  ;;  %v774_v6 = vpop.f32.mrb[2].mxu0 }
 0x158   :  { %v775_v7 = vpop.f32.mrb[3].mxu0 }
 0x159   :  { %v981_v8 = vpack.c.bf16 %v1027_v5, %v1026_v2 }
 0x15b   :  { %v870_v10 = vrot.slane %v981_v8, %v1288_v39 }
 0x15d   :  { %v878_v11 = vcombine.low %v870_v10, %v877_v9 }
 0x15f   :  { %880 = vst [vmem:[%s1501_s3] sm:$0x3f] %v878_v11 }

// kernel: reference_encoder_forward.9
= control target key start
LH: loop header
LB: loop body
LE: loop exit
PB: predicated region body
PF: predicated region fallthrough
CT: control target
= control target key end

     0   :  { %v614_v2 = vmov 0.0   ;;  %v615_v3 = vmov 0   ;;  %vm616_vm0 = vmmov 0   ;;  %s757_s0 = inlined_call_operand.vmem [shape: bf16[2,2,384], index: 0, kind: input, shape index: {}]   ;;  %s758_s1 = inlined_call_operand.vmem [shape: bf16[128,384], index: 1, kind: input, shape index: {}]   ;;  %s759_s2 = inlined_call_operand.vmem [shape: f32[1,384], index: 2, kind: input, shape index: {}]   ;;  %s760_s3 = inlined_call_operand.hbm [shape: f32[2,128], index: 3, kind: output, shape index: {}]  }
   0x1   :  { %v538_v0 = vld [vmem:[%s758_s1 + $0x4] ss:$12 sps:$4 sm:$0xff]   ;;  %v540_v1 = vld [vmem:[%s758_s1] ss:$12 sps:$4 sm:$0xff]   ;;  %494 = vmatprep.subr.bf16.mxu1 %v614_v2  ;;  %20 = vst [vmem:[#allocation2] sm:$0x3] %v614_v2  ;;  %234 = vmatprep.mubr.bf16.mxu0 %v615_v3 }
   0x2   :  { %202 = vmatprep.subr.bf16.mxu0 %v538_v0  ;;  %v541_v4 = vld [vmem:[%s758_s1 + $0x1c] ss:$12 sps:$4 sm:$0xff]   ;;  %510 = vmatprep.mubr.msk.bf16.mxu1 %vm616_vm0, %v614_v2  ;;  %v543_v5 = vld [vmem:[%s758_s1 + $0x18] ss:$12 sps:$4 sm:$0xff]   ;;  %v544_v6 = vld [vmem:[%s758_s1 + $0x34] ss:$12 sps:$4 sm:$0xff]  }
   0x3   :  { %203 = vmatpush1.bf16.msra.mxu0 %v540_v1  ;;  %v546_v7 = vld [vmem:[%s758_s1 + $0x30] ss:$12 sps:$4 sm:$0xff]   ;;  %v547_v8 = vld [vmem:[%s758_s1 + $0x4c] ss:$12 sps:$4 sm:$0xff]   ;;  %v559_v9 = vld [vmem:[%s758_s1 + $0x8] ss:$12 sps:$4 sm:$0xff]  }
   0x4   :  { %204 = vmatprep.subr.bf16.mxu0 %v541_v4  ;;  %v549_v10 = vld [vmem:[%s758_s1 + $0x48] ss:$12 sps:$4 sm:$0xff]   ;;  %v550_v11 = vld [vmem:[%s758_s1 + $0x64] ss:$12 sps:$4 sm:$0xff]   ;;  %495 = vmatpush3.bf16.msra.mxu1 %v559_v9  ;;  %v563_v12 = vld [vmem:[%s758_s1 + $0x20] ss:$12 sps:$4 sm:$0xff]  }
   0x5   :  { %496 = vmatprep.subr.bf16.mxu1 %v614_v2  ;;  %v552_v13 = vld [vmem:[%s758_s1 + $0x60] ss:$12 sps:$4 sm:$0xff]   ;;  %v553_v14 = vld [vmem:[%s758_s1 + $0x7c] ss:$12 sps:$4 sm:$0xff]   ;;  %v564_v15 = vld [vmem:[%s758_s1 + $0x38] ss:$12 sps:$4 sm:$0xff]  }
   0x6   :  { %v555_v16 = vld [vmem:[%s758_s1 + $0x78] ss:$12 sps:$4 sm:$0xff]  }
   0x7   :  { %205 = vmatpush1.bf16.msra.mxu0 %v543_v5 }
   0x8   :  { %206 = vmatprep.subr.bf16.mxu0 %v544_v6  ;;  %497 = vmatpush3.bf16.msra.mxu1 %v563_v12 }
   0x9   :  { %498 = vmatprep.subr.bf16.mxu1 %v614_v2 }
   0xb   :  { %207 = vmatpush1.bf16.msra.mxu0 %v546_v7 }
   0xc   :  { %208 = vmatprep.subr.bf16.mxu0 %v547_v8 }
   0xf   :  { %209 = vmatpush1.bf16.msra.mxu0 %v549_v10 }
  0x10   :  { %210 = vmatprep.subr.bf16.mxu0 %v550_v11 }
  0x13   :  { %211 = vmatpush1.bf16.msra.mxu0 %v552_v13 }
  0x14   :  { %8 = vsyncpa [#allocation3], 0  ;;  %212 = vmatprep.subr.bf16.mxu0 %v553_v14  ;;  %v556_v17 = vld [vmem:[%s758_s1 + $0x94] ss:$12 sps:$4 sm:$0xff]   ;;  %499 = vmatpush3.bf16.msra.mxu1 %v564_v15  ;;  %v565_v18 = vld [vmem:[%s758_s1 + $0x50] ss:$12 sps:$4 sm:$0xff]   ;;  %v59_v28 = vlaneseq }
  0x15   :  { %500 = vmatprep.subr.bf16.mxu1 %v614_v2  ;;  %v558_v19 = vld [vmem:[%s758_s1 + $0x90] ss:$12 sps:$4 sm:$0xff]   ;;  %v560_v20 = vld [vmem:[%s758_s1 + $0xac] ss:$12 sps:$4 sm:$0xff]   ;;  %v566_v21 = vld [vmem:[%s758_s1 + $0x68] ss:$12 sps:$4 sm:$0xff]  }
  0x16   :  { %v562_v22 = vld [vmem:[%s758_s1 + $0xa8] ss:$12 sps:$4 sm:$0xff]   ;;  %v709_v23 = vld [vmem:[#allocation2] sm:$0x3]  ;;  %v568_v26 = vld [vmem:[%s758_s1 + $0x98] ss:$12 sps:$4 sm:$0xff]  }
  0x17   :  { %213 = vmatpush1.bf16.msra.mxu0 %v555_v16  ;;  %v567_v24 = vld [vmem:[%s758_s1 + $0x80] ss:$12 sps:$4 sm:$0xff]   ;;  %v57_v25 = vpack.c.bf16 %v709_v23, %v709_v23  ;;  %v569_v27 = vld [vmem:[%s758_s1 + $0xb0] ss:$12 sps:$4 sm:$0xff]   ;;  %v60_v29 = vshrl.u32 %v59_v28, 7 }
  0x18   :  { %214 = vmatprep.subr.bf16.mxu0 %v556_v17  ;;  %501 = vmatpush3.bf16.msra.mxu1 %v565_v18  ;;  %v54_v31 = vld [vmem:[%s759_s2] sm:$0x7] }
  0x19   :  { %502 = vmatprep.subr.bf16.mxu1 %v614_v2  ;;  %v61_v30 = vsub.s32 0, %v60_v29  ;;  %v65_v32 = vsub.s32 1, %v60_v29  ;;  %v55_v33 = vld [vmem:[%s757_s0] sm:$0x7]  ;;  %v69_v54 = vsub.s32 2, %v60_v29 }
  0x1a   :  { %v56_v35 = vunpack.c.l.bf16 %v55_v33 }
  0x1b   :  { %215 = vmatpush1.bf16.msra.mxu0 %v558_v19  ;;  %v62_v34 = vrot.slane %v54_v31, %v61_v30  ;;  %v66_v36 = vrot.slane %v54_v31, %v65_v32  ;;  %v70_v55 = vrot.slane %v54_v31, %v69_v54 }
  0x1c   :  { %216 = vmatprep.subr.bf16.mxu0 %v560_v20  ;;  %503 = vmatpush3.bf16.msra.mxu1 %v566_v21  ;;  %v291_v41 = vrot.slane %v56_v35, 2  ;;  %v301_v59 = vrot.slane %v56_v35, 4 }
  0x1d   :  { %504 = vmatprep.subr.bf16.mxu1 %v614_v2 }
  0x1f   :  { %217 = vmatpush1.bf16.msra.mxu0 %v562_v22 }
  0x20   :  { %505 = vmatpush3.bf16.msra.mxu1 %v567_v24  ;;  %319 = vmatprep.subr.bf16.mxu0 %v538_v0 }
  0x21   :  { %506 = vmatprep.subr.bf16.mxu1 %v614_v2 }
  0x22   :  { %235 = vmatmul.mubr.bf16.vlgmr.msra.gmra.mrb[0].mxu0 %v57_v25 }
  0x23   :  { %320 = vmatpush1.bf16.msra.mxu0 %v540_v1  ;;  %351 = vmatprep.mubr.bf16.mxu0 %v615_v3 }
  0x24   :  { %507 = vmatpush3.bf16.msra.mxu1 %v568_v26  ;;  %321 = vmatprep.subr.bf16.mxu0 %v541_v4 }
  0x25   :  { %508 = vmatprep.subr.bf16.mxu1 %v614_v2 }
  0x27   :  { %322 = vmatpush1.bf16.msra.mxu0 %v543_v5 }
  0x28   :  { %509 = vmatpush3.bf16.msra.mxu1 %v569_v27  ;;  %323 = vmatprep.subr.bf16.mxu0 %v544_v6  ;;  %v473_v6 = vld [vmem:[%s757_s0 + $0x3] sm:$0x7]  ;;  %s617_s0 = smov [#allocation2]  }
  0x29   :  { %514 = vmatprep.subr.bf16.mxu1 %v614_v2  ;;  %s439_s10 = sshll.u32 %s617_s0, 4  ;;  %s440_s10 = int_to_ptr.vmem [resolvable:$true] %s439_s10 }
  0x2a   :  { %s590_s11 = scalar_lea.vmem %s440_s10, 32  ;;  %p595_p1 = scmp.lt.s32.totalorder %s440_s10, %s440_s10 }
  0x2b   :  { %511 = vmatmul.mubr.bf16.vlgmr.msra.gmra.mrb[0].mxu1 %v57_v25  ;;  %324 = vmatpush1.bf16.msra.mxu0 %v546_v7  ;;  %v317_v7 = vunpack.c.l.bf16 %v473_v6  ;;  %p591_p0 = scmp.ne.s32.totalorder %s440_s10, %s590_s11  ;;  %p596_p2 = scmp.lt.s32.totalorder %s590_s11, %s590_s11 }
  0x2c   :  { %515 = vmatpush3.bf16.msra.mxu1 %v559_v9  ;;  %325 = vmatprep.subr.bf16.mxu0 %v547_v8 }
  0x2d   :  { %516 = vmatprep.subr.bf16.mxu1 %v614_v2  ;;  %530 = vmatprep.mubr.msk.bf16.mxu1 %vm616_vm0, %v614_v2  ;;  %v418_v28 = vrot.slane %v317_v7, 4  ;;  %p597_p3 = por %p596_p2, %p595_p1 }
  0x2f   :  { %326 = vmatpush1.bf16.msra.mxu0 %v549_v10  ;;  %p598_p4 = pnand %p597_p3, %p591_p0 }
  0x30   :  { %517 = vmatpush3.bf16.msra.mxu1 %v563_v12  ;;  %327 = vmatprep.subr.bf16.mxu0 %v550_v11 }
  0x31   :  { %518 = vmatprep.subr.bf16.mxu1 %v614_v2 }
  0x33   :  { %328 = vmatpush1.bf16.msra.mxu0 %v552_v13 }
  0x34   :  { %519 = vmatpush3.bf16.msra.mxu1 %v564_v15  ;;  %329 = vmatprep.subr.bf16.mxu0 %v553_v14  ;;  %v408_v14 = vrot.slane %v317_v7, 2 }
  0x35   :  { %520 = vmatprep.subr.bf16.mxu1 %v614_v2 }
  0x37   :  { %330 = vmatpush1.bf16.msra.mxu0 %v555_v16 }
  0x38   :  { %521 = vmatpush3.bf16.msra.mxu1 %v565_v18  ;;  %331 = vmatprep.subr.bf16.mxu0 %v556_v17 }
  0x39   :  { %522 = vmatprep.subr.bf16.mxu1 %v614_v2 }
  0x3b   :  { %332 = vmatpush1.bf16.msra.mxu0 %v558_v19 }
  0x3c   :  { %523 = vmatpush3.bf16.msra.mxu1 %v566_v21  ;;  %333 = vmatprep.subr.bf16.mxu0 %v560_v20 }
  0x3d   :  { %524 = vmatprep.subr.bf16.mxu1 %v614_v2 }
  0x3f   :  { %334 = vmatpush1.bf16.msra.mxu0 %v562_v22 }
  0x40   :  { %525 = vmatpush3.bf16.msra.mxu1 %v567_v24 }
  0x41   :  { %526 = vmatprep.subr.bf16.mxu1 %v614_v2 }
  0x44   :  { %527 = vmatpush3.bf16.msra.mxu1 %v568_v26 }
  0x45   :  { %528 = vmatprep.subr.bf16.mxu1 %v614_v2 }
  0x48   :  { %529 = vmatpush3.bf16.msra.mxu1 %v569_v27 }
  0xf5   :  { %v236_v37 = vpop.f32.mrb[0].mxu0 }
  0xf6   :  { %v237_v38 = vadd.f32 %v236_v37, %v62_v34  ;;  %v238_v39 = vpop.f32.mrb[1].mxu0 }
  0xf7   :  { %v239_v40 = vadd.f32 %v238_v39, %v66_v36  ;;  %v240_v42 = vpop.f32.mrb[2].mxu0 }
  0xf8   :  { %v283_v43 = vadd.f32 %v237_v38, %v56_v35  ;;  %v241_v44 = vpop.f32.mrb[3].mxu0 }
  0xf9   :  { %v293_v46 = vadd.f32 %v291_v41, %v239_v40 }
  0xfa   :  { %v471_v45 = vmul.f32 -1.442695, %v283_v43 }
  0xfb   :  { %v472_v48 = vmul.f32 -1.442695, %v293_v46 }
  0xfc   :  { %570 = vpow2.f32 %v471_v45 }
  0xfd   :  { %572 = vpow2.f32 %v472_v48 }
  0xfe   :  { %v277_v47 = vpop.f32.mrb[0].mxu1 }
  0xff   :  { %v512_v49 = vpop.f32.mrb[1].mxu1  ;;  %v278_v58 = vadd.f32 %v277_v47, %v70_v55 }
 0x100   :  { %v280_v50 = vpop.f32.mrb[2].mxu1 }
 0x101   :  { %v513_v51 = vpop.f32.mrb[3].mxu1 }
 0x106   :  { %v571_v52 = vpop.eup %570 }
 0x107   :  { %v287_v53 = vadd.f32 1.0, %v571_v52  ;;  %v573_v56 = vpop.eup %572 }
 0x108   :  { %v297_v57 = vadd.f32 1.0, %v573_v56 }
 0x109   :  { %574 = vrcp.f32 %v287_v53 }
 0x10a   :  { %576 = vrcp.f32 %v297_v57 }
 0x113   :  { %v575_v60 = vpop.eup %574 }
 0x114   :  { %v300_v61 = vmul.f32 %v575_v60, %v278_v58  ;;  %v577_v63 = vpop.eup %576 }
 0x115   :  { %v305_v0 = vsub.f32 1.0, %v577_v63  ;;  %v307_v3 = vmul.f32 %v577_v63, %v709_v23 }
 0x116   :  { %v303_v62 = vadd.f32 %v301_v59, %v300_v61 }
 0x118   :  { %578 = vtanh.f32 %v303_v62 }
 0x122   :  { %v579_v1 = vpop.eup %578 }
 0x123   :  { %v306_v2 = vmul.f32 %v579_v1, %v305_v0 }
 0x125   :  { %v308_v4 = vadd.f32 %v307_v3, %v306_v2 }
 0x127   :  { %v318_v5 = vpack.c.bf16 %v308_v4, %v308_v4 }
 0x129   :  { %352 = vmatmul.mubr.bf16.vlgmr.msra.gmra.mrb[4].mxu0 %v318_v5  ;;  %531 = vmatmul.mubr.bf16.vlgmr.msra.gmra.mrb[4].mxu1 %v318_v5 }
 0x1fc   :  { %v353_v8 = vpop.f32.mrb[4].mxu0  ;;  %v394_v9 = vpop.f32.mrb[4].mxu1 }
 0x1fd   :  { %v354_v10 = vadd.f32 %v353_v8, %v62_v34  ;;  %v355_v11 = vpop.f32.mrb[5].mxu0  ;;  %v532_v12 = vpop.f32.mrb[5].mxu1  ;;  %v395_v27 = vadd.f32 %v394_v9, %v70_v55 }
 0x1fe   :  { %v356_v13 = vadd.f32 %v355_v11, %v66_v36  ;;  %v357_v15 = vpop.f32.mrb[6].mxu0  ;;  %v397_v16 = vpop.f32.mrb[6].mxu1 }
 0x1ff   :  { %v400_v17 = vadd.f32 %v354_v10, %v317_v7  ;;  %v358_v18 = vpop.f32.mrb[7].mxu0  ;;  %v533_v19 = vpop.f32.mrb[7].mxu1 }
 0x200   :  { %v410_v21 = vadd.f32 %v408_v14, %v356_v13 }
 0x201   :  { %v474_v20 = vmul.f32 -1.442695, %v400_v17 }
 0x202   :  { %v475_v22 = vmul.f32 -1.442695, %v410_v21 }
 0x203   :  { %580 = vpow2.f32 %v474_v20 }
 0x204   :  { %582 = vpow2.f32 %v475_v22 }
 0x20d   :  { %v581_v23 = vpop.eup %580 }
 0x20e   :  { %v404_v24 = vadd.f32 1.0, %v581_v23  ;;  %v583_v25 = vpop.eup %582 }
 0x20f   :  { %v414_v26 = vadd.f32 1.0, %v583_v25 }
 0x210   :  { %584 = vrcp.f32 %v404_v24 }
 0x211   :  { %586 = vrcp.f32 %v414_v26 }
 0x21a   :  { %v585_v29 = vpop.eup %584 }
 0x21b   :  { %v417_v30 = vmul.f32 %v585_v29, %v395_v27  ;;  %v587_v32 = vpop.eup %586 }
 0x21c   :  { %v422_v33 = vsub.f32 1.0, %v587_v32  ;;  %v424_v36 = vmul.f32 %v587_v32, %v308_v4 }
 0x21d   :  { %v420_v31 = vadd.f32 %v418_v28, %v417_v30 }
 0x21f   :  { %588 = vtanh.f32 %v420_v31 }
 0x229   :  { %v589_v34 = vpop.eup %588 }
 0x22a   :  { %v423_v35 = vmul.f32 %v589_v34, %v422_v33 }
 0x22c   :  { %v425_v37 = vadd.f32 %v424_v36, %v423_v35 }
 0x22e   :  { %432 = vst [vmem:[#allocation2] sm:$0x3] %v425_v37 }
 0x22f   :  { %601 = shalt.err (!%p598_p4)
}
 0x230   :  { %s602_s14 = scalar_lea.hbm %s760_s3, 32 }
 0x231   :  { %p603_p5 = scmp.ne.s32.totalorder %s760_s3, %s602_s14  ;;  %p606_p6 = scmp.lt.u32.totalorder %s602_s14, %s760_s3 }
 0x233   :  { %p608_p7 = pnand %p606_p6, %p603_p5 }
 0x235   :  { %611 = shalt.err (!%p608_p7)
}
 0x236   :  { %442 = dma.vmem_to_hbm [thread:$0]  %s440_s10, 32, %s760_s3, [#allocation3]  }
 0x237   :  { %612 = dma.done.wait [#allocation3], 32  }
 0x238   :  { %613 = vsyncadd [#allocation3], 4294967264 }
 0x239   :  { %446 = vsyncpa [#allocation3], 1 }

</bundles_post_ra>
